<compile_context>
chip_gen: v6e
topology: v6e:2x2x1
jax: 0.10.0
libtpu: 0.0.40
codegen_flags: <defaults>
</compile_context>

<pallas_src>
import jax
import jax.numpy as jnp
from jax import lax
from jax.experimental import pallas as pl
from jax.experimental.pallas import tpu as pltpu

# ---- synthetic protagonist network hyper-parameters ----
H, W, CIN = 16, 16, 4          # input_shape = (CIN, H, W)
C1, C2 = 8, 16                 # conv channels
HID = 32                       # fc hidden width
OUT = 5                        # pursuit action space size
TAU = 1.0                      # gumbel-softmax temperature

B_TILE_MAX = 64                # images per grid step (sweepable 64-128)
HID_PAD = 128                  # lane-dense fc hidden width (zero padded)
OUT_PAD = 128                  # lane-dense logits width (sliced to OUT outside)
NEG_BIG = -1e9                 # bias for padded logit lanes (softmax-neutral)

WCIN, WC1, WC2 = W * CIN, W * C1, W * C2
K1 = 3 * WCIN                  # conv1 fused contraction dim (ky x (w, cin))
K2 = 3 * WC1                   # conv2 fused contraction dim (ky x (w, c1))


# ----------------------------- Pallas kernel -----------------------------
def make_kernel(use_gumbel):
    def kernel(*refs):
        if use_gumbel:
            (x_ref, w1_ref, b1_ref, w2_ref, b2_ref,
             wf1_ref, bf1_ref, wf2_ref, bf2_ref, g_ref,
             out_ref, h2s_ref) = refs
        else:
            (x_ref, w1_ref, b1_ref, w2_ref, b2_ref,
             wf1_ref, bf1_ref, wf2_ref, bf2_ref,
             out_ref, h2s_ref) = refs
            g_ref = None

        BT = out_ref.shape[0]          # batch tile (multiple of 16)
        M = H * BT                     # matmul rows, h-major: row = h*BT + b

        # ---- conv1: single wide-K matmul (K=192).  ky folded into lanes by
        # the wrapper im2col; kx taps + W padding folded into band weights. ----
        h1 = jnp.dot(x_ref[...], w1_ref[...],
                     preferred_element_type=jnp.float32)
        h1 = jnp.maximum(h1 + b1_ref[...], 0.0).astype(jnp.bfloat16)   # (M, WC1)

        # ---- conv2: single wide-K matmul (K=384).  In-register ky-im2col via
        # aligned whole-slab shifts (h-major rows => +/-1 row == +/-BT rows). ----
        zslab = jnp.zeros((BT, WC1), jnp.bfloat16)
        up = jnp.concatenate([zslab, h1[:M - BT, :]], axis=0)   # reads h-1
        dn = jnp.concatenate([h1[BT:, :], zslab], axis=0)       # reads h+1
        h1_cat = jnp.concatenate([up, h1, dn], axis=-1)         # (M, K2) bf16
        h2 = jnp.dot(h1_cat, w2_ref[...],
                     preferred_element_type=jnp.float32)
        h2 = jnp.maximum(h2 + b2_ref[...], 0.0).astype(jnp.bfloat16)   # (M, WC2)

        # ---- fc1: stage h2 once in VMEM, then H aligned slab dots
        # (M=BT, K=WC2, N=HID_PAD) accumulated in f32 (init with first dot). ----
        h2s_ref[...] = h2
        acc3 = jnp.dot(h2s_ref[0:BT, :], wf1_ref[0],
                       preferred_element_type=jnp.float32)
        for hh in range(1, H):
            acc3 = acc3 + jnp.dot(h2s_ref[hh * BT:(hh + 1) * BT, :],
                                  wf1_ref[hh],
                                  preferred_element_type=jnp.float32)
        h3 = jnp.maximum(acc3 + bf1_ref[...], 0.0)               # (BT, HID_PAD)

        # ---- fc2: lane-dense logits; padded bias lanes = NEG_BIG. ----
        logits = jnp.dot(h3.astype(jnp.bfloat16), wf2_ref[...],
                         preferred_element_type=jnp.float32) + bf2_ref[...]

        if use_gumbel:
            z = (logits + g_ref[...]) * (1.0 / TAU)
            z = z - jnp.max(z, axis=-1, keepdims=True)
            e = jnp.exp(z)                                       # padded lanes -> 0
            out_ref[...] = e / jnp.sum(e, axis=-1, keepdims=True)
        else:
            out_ref[...] = logits

    return kernel


# --------------------------- wrapper / pallas_call ---------------------------
def _pallas_forward(x_nchw, wops, gumbel=None):
    (w1f, b1t, w2f, b2t, wf1, bf1, wf2p, bf2p) = wops
    B = x_nchw.shape[0]
    use_gumbel = gumbel is not None

    bt = min(B_TILE_MAX, ((B + 15) // 16) * 16)   # multiple of 16 (bf16 tile)
    n_blk = pl.cdiv(B, bt)
    B_pad = n_blk * bt

    # ky-im2col of x (done once, outside the kernel), then relayout so that
    # rows are [block, h, local-batch] -> each grid step reads one contiguous
    # (H*bt, K1) slab with rows ordered h-major.
    x_nhwc = jnp.transpose(x_nchw, (0, 2, 3, 1)).reshape(B, H, WCIN)
    x_hp = jnp.pad(x_nhwc, ((0, 0), (1, 1), (0, 0)))            # pad H only
    x_i2c = jnp.concatenate([x_hp[:, ky:ky + H, :] for ky in range(3)], axis=-1)
    x_i2c = jnp.pad(x_i2c, ((0, B_pad - B), (0, 0), (0, 0)))    # (B_pad, H, K1)
    x_p = (x_i2c.reshape(n_blk, bt, H, K1)
                 .transpose(0, 2, 1, 3)
                 .reshape(n_blk * H * bt, K1)
                 .astype(jnp.bfloat16))

    if use_gumbel:
        gumbel = jnp.pad(gumbel, ((0, B_pad - B), (0, OUT_PAD - OUT)))

    def full(shape):
        n = len(shape)
        return pl.BlockSpec(shape, lambda b, n=n: (0,) * n)

    in_specs = [
        pl.BlockSpec((H * bt, K1), lambda b: (b, 0)),   # x (h-major batch tile)
        full((K1, WC1)),           # conv1 fused band weights (bf16)
        full((1, WC1)),            # conv1 bias (W-tiled, f32)
        full((K2, WC2)),           # conv2 fused band weights (bf16)
        full((1, WC2)),            # conv2 bias (W-tiled, f32)
        full((H, WC2, HID_PAD)),   # fc1 weight per h-slab (bf16, HID zero-padded)
        full((1, HID_PAD)),        # fc1 bias (zero-padded)
        full((HID_PAD, OUT_PAD)),  # fc2 weight (zero-padded, bf16)
        full((1, OUT_PAD)),        # fc2 bias, padded lanes = NEG_BIG
    ]
    args = [x_p, w1f, b1t, w2f, b2t, wf1, bf1, wf2p, bf2p]
    if use_gumbel:
        in_specs.append(pl.BlockSpec((bt, OUT_PAD), lambda b: (b, 0)))
        args.append(gumbel)

    out = pl.pallas_call(
        make_kernel(use_gumbel),
        out_shape=jax.ShapeDtypeStruct((B_pad, OUT_PAD), jnp.float32),
        grid_spec=pltpu.PrefetchScalarGridSpec(
            num_scalar_prefetch=0,
            grid=(n_blk,),
            in_specs=in_specs,
            out_specs=pl.BlockSpec((bt, OUT_PAD), lambda b: (b, 0)),
            scratch_shapes=[pltpu.VMEM((H * bt, WC2), jnp.bfloat16)],
        ),
        compiler_params=pltpu.CompilerParams(
            dimension_semantics=("parallel",)),
    )(*args)
    return out[:B, :OUT]


# --------------------------- parameters & glue ---------------------------
def init_params(key):
    ks = jax.random.split(key, 8)

    def init(k, shape, fan_in):
        return (jax.random.normal(k, shape, jnp.float32) /
                jnp.sqrt(jnp.float32(fan_in))).astype(jnp.float32)

    return dict(
        w1=init(ks[0], (3, 3, CIN, C1), 9 * CIN),
        b1=init(ks[1], (C1,), 1.0) * 0.1,
        w2=init(ks[2], (3, 3, C1, C2), 9 * C1),
        b2=init(ks[3], (C2,), 1.0) * 0.1,
        wf1=init(ks[4], (H * W * C2, HID), H * W * C2),
        bf1=init(ks[5], (HID,), 1.0) * 0.1,
        wf2=init(ks[6], (HID, OUT), HID),
        bf2=init(ks[7], (OUT,), 1.0) * 0.1,
    )


def prepare_weights(p):
    def band(w, cin, cout):
        # (3,3,cin,cout) -> (3*W*cin, W*cout), ky-major rows: output col wo
        # reads input col wo + kx - 1; out-of-range cols are simply absent
        # (= zero "same" padding in W).
        mats = []
        for ky in range(3):
            m = jnp.zeros((W * cin, W * cout), jnp.float32)
            for kx in range(3):
                m = m + jnp.kron(jnp.eye(W, k=1 - kx, dtype=jnp.float32),
                                 w[ky, kx])
            mats.append(m)
        return jnp.concatenate(mats, axis=0)

    w1f = band(p['w1'], CIN, C1).astype(jnp.bfloat16)
    w2f = band(p['w2'], C1, C2).astype(jnp.bfloat16)
    b1t = jnp.tile(p['b1'], W).reshape(1, WC1)
    b2t = jnp.tile(p['b2'], W).reshape(1, WC2)
    wf1 = jnp.pad(p['wf1'].reshape(H, WC2, HID),
                  ((0, 0), (0, 0), (0, HID_PAD - HID))).astype(jnp.bfloat16)
    bf1 = jnp.pad(p['bf1'].reshape(1, HID), ((0, 0), (0, HID_PAD - HID)))
    wf2p = jnp.pad(p['wf2'],
                   ((0, HID_PAD - HID), (0, OUT_PAD - OUT))).astype(jnp.bfloat16)
    bf2p = jnp.concatenate(
        [p['bf2'].reshape(1, OUT),
         jnp.full((1, OUT_PAD - OUT), NEG_BIG, jnp.float32)], axis=1)
    return (w1f, b1t, w2f, b2t, wf1, bf1, wf2p, bf2p)


def sample_gumbel(rng, shape):
    u = jax.random.uniform(rng, shape, minval=1e-6, maxval=1.0 - 1e-6)
    return -jnp.log(-jnp.log(u))


def pursuit_forward(x, params, hidden_state=None, use_gumbel_softmax=False, rng=None):
    """Mirrors PursuitModule.forward(x, hidden_state, use_gumbel_softmax)."""
    if hidden_state is not None:
        # TODO(synk): recurrent protagonist (hidden_state branch) not implemented.
        raise NotImplementedError("hidden_state path not implemented")
    wops = prepare_weights(params)
    if use_gumbel_softmax:
        g = sample_gumbel(rng, (x.shape[0], OUT))
        return _pallas_forward(x, wops, gumbel=g)
    return _pallas_forward(x, wops)


# ------------------------------ JAX reference ------------------------------
def reference_forward(x, params, gumbel=None):
    dn = ('NHWC', 'HWIO', 'NHWC')
    x_nhwc = jnp.transpose(x, (0, 2, 3, 1))
    h1 = lax.conv_general_dilated(x_nhwc, params['w1'], (1, 1), ((1, 1), (1, 1)),
                                  dimension_numbers=dn,
                                  precision=lax.Precision.HIGHEST)
    h1 = jax.nn.relu(h1 + params['b1'])
    h2 = lax.conv_general_dilated(h1, params['w2'], (1, 1), ((1, 1), (1, 1)),
                                  dimension_numbers=dn,
                                  precision=lax.Precision.HIGHEST)
    h2 = jax.nn.relu(h2 + params['b2'])
    flat = h2.reshape(x.shape[0], H * W * C2)
    h3 = jax.nn.relu(jnp.dot(flat, params['wf1'],
                             precision=lax.Precision.HIGHEST) + params['bf1'])
    logits = jnp.dot(h3, params['wf2'],
                     precision=lax.Precision.HIGHEST) + params['bf2']
    if gumbel is not None:
        return jax.nn.softmax((logits + gumbel) / TAU, axis=-1)
    return logits


if __name__ == "__main__":
    key = jax.random.PRNGKey(0)
    pkey, xkey, gkey, x2key = jax.random.split(key, 4)
    params = init_params(pkey)
    x = jax.random.normal(xkey, (2, CIN, H, W), jnp.float32)   # NCHW, as in PyTorch

    # Default path (hidden_state=None, use_gumbel_softmax=False) -> logits.
    # Tolerance reflects bf16 operands / f32 MXU accumulation vs f32 reference.
    logits = jax.block_until_ready(pursuit_forward(x, params))
    assert logits.shape == (2, OUT)
    ref_logits = reference_forward(x, params)
    assert jnp.allclose(logits, ref_logits, atol=5e-2, rtol=5e-2), (
        float(jnp.max(jnp.abs(logits - ref_logits))))

    # Gumbel-softmax path -> action probabilities.
    probs = jax.block_until_ready(
        pursuit_forward(x, params, use_gumbel_softmax=True, rng=gkey))
    g = sample_gumbel(gkey, (2, OUT))
    ref_probs = reference_forward(x, params, gumbel=g)
    assert jnp.allclose(probs, ref_probs, atol=3e-2, rtol=3e-2), (
        float(jnp.max(jnp.abs(probs - ref_probs))))
    assert jnp.allclose(jnp.sum(probs, axis=-1), 1.0, atol=1e-3)

    # Larger batch: exercises the full B_TILE=64 tile, batch padding, and a
    # multi-step grid (n_blk=2, so both v7x TensorCores get work).
    xb = jax.random.normal(x2key, (80, CIN, H, W), jnp.float32)
    logits_b = jax.block_until_ready(pursuit_forward(xb, params))
    ref_b = reference_forward(xb, params)
    assert logits_b.shape == (80, OUT)
    assert jnp.allclose(logits_b, ref_b, atol=5e-2, rtol=5e-2), (
        float(jnp.max(jnp.abs(logits_b - ref_b))))

    print("KERNEL_OK")
</pallas_src>

<mosaic_0001>
module attributes {stable_mosaic.version = 11 : i64} {
  func.func @kernel(%arg0: i32, %arg1: memref<256x192xbf16, #tpu.memory_space<vmem>>, %arg2: memref<192x128xbf16, #tpu.memory_space<vmem>>, %arg3: memref<1x128xf32, #tpu.memory_space<vmem>>, %arg4: memref<384x256xbf16, #tpu.memory_space<vmem>>, %arg5: memref<1x256xf32, #tpu.memory_space<vmem>>, %arg6: memref<16x256x128xbf16, #tpu.memory_space<vmem>>, %arg7: memref<1x128xf32, #tpu.memory_space<vmem>>, %arg8: memref<128x128xbf16, #tpu.memory_space<vmem>>, %arg9: memref<1x128xf32, #tpu.memory_space<vmem>>, %arg10: memref<16x128xf32, #tpu.memory_space<vmem>>, %arg11: memref<256x256xbf16, #tpu.memory_space<vmem>>) attributes {dimension_semantics = [#tpu.dimension_semantics<parallel>], iteration_bounds = array<i64: 1>, scalar_prefetch = 0 : i64, scratch_operands = 1 : i64, tpu.core_type = #tpu.core_type<tc>, window_params = [{transform_indices = @transform_0, window_bounds = array<i64: 256, 192>}, {pipeline_mode = #tpu.pipeline_mode<synchronous>, transform_indices = @transform_1, window_bounds = array<i64: 192, 128>}, {pipeline_mode = #tpu.pipeline_mode<synchronous>, transform_indices = @transform_2, window_bounds = array<i64: 1, 128>}, {pipeline_mode = #tpu.pipeline_mode<synchronous>, transform_indices = @transform_3, window_bounds = array<i64: 384, 256>}, {pipeline_mode = #tpu.pipeline_mode<synchronous>, transform_indices = @transform_4, window_bounds = array<i64: 1, 256>}, {pipeline_mode = #tpu.pipeline_mode<synchronous>, transform_indices = @transform_5, window_bounds = array<i64: 16, 256, 128>}, {pipeline_mode = #tpu.pipeline_mode<synchronous>, transform_indices = @transform_6, window_bounds = array<i64: 1, 128>}, {pipeline_mode = #tpu.pipeline_mode<synchronous>, transform_indices = @transform_7, window_bounds = array<i64: 128, 128>}, {pipeline_mode = #tpu.pipeline_mode<synchronous>, transform_indices = @transform_8, window_bounds = array<i64: 1, 128>}, {transform_indices = @transform_9, window_bounds = array<i64: 16, 128>}]} {
    %c0 = arith.constant 0 : index
    %c0_0 = arith.constant 0 : index
    %0 = vector.load %arg1[%c0, %c0_0] : memref<256x192xbf16, #tpu.memory_space<vmem>>, vector<256x192xbf16>
    %c0_1 = arith.constant 0 : index
    %c0_2 = arith.constant 0 : index
    %1 = vector.load %arg2[%c0_1, %c0_2] : memref<192x128xbf16, #tpu.memory_space<vmem>>, vector<192x128xbf16>
    %cst = arith.constant dense<0.000000e+00> : vector<256x128xf32>
    %2 = tpu.matmul %0, %1, %cst {dimension_numbers = #tpu.dot_dimension_numbers<[1], [0], [0], [1], [0, 0, 1, 1], [], []>} : vector<256x192xbf16>, vector<192x128xbf16>, vector<256x128xf32> -> vector<256x128xf32>
    %c0_3 = arith.constant 0 : index
    %c0_4 = arith.constant 0 : index
    %3 = vector.load %arg3[%c0_3, %c0_4] : memref<1x128xf32, #tpu.memory_space<vmem>>, vector<1x128xf32>
    %4 = vector.broadcast %3 : vector<1x128xf32> to vector<256x128xf32>
    %5 = arith.addf %2, %4 : vector<256x128xf32>
    %cst_5 = arith.constant 0.000000e+00 : f32
    %6 = vector.broadcast %cst_5 : f32 to vector<256x128xf32>
    %7 = arith.maximumf %5, %6 : vector<256x128xf32>
    %8 = arith.truncf %7 : vector<256x128xf32> to vector<256x128xbf16>
    %cst_6 = arith.constant 0.000000e+00 : bf16
    %9 = vector.broadcast %cst_6 : bf16 to vector<16x128xbf16>
    %10 = vector.extract_strided_slice %8 {offsets = [0, 0], sizes = [240, 128], strides = [1, 1]} : vector<256x128xbf16> to vector<240x128xbf16>
    %11 = tpu.concatenate %9, %10 in 0 : vector<16x128xbf16>, vector<240x128xbf16> -> vector<256x128xbf16>
    %12 = vector.extract_strided_slice %8 {offsets = [16, 0], sizes = [240, 128], strides = [1, 1]} : vector<256x128xbf16> to vector<240x128xbf16>
    %13 = tpu.concatenate %12, %9 in 0 : vector<240x128xbf16>, vector<16x128xbf16> -> vector<256x128xbf16>
    %14 = tpu.concatenate %11, %8, %13 in 1 : vector<256x128xbf16>, vector<256x128xbf16>, vector<256x128xbf16> -> vector<256x384xbf16>
    %c0_7 = arith.constant 0 : index
    %c0_8 = arith.constant 0 : index
    %15 = vector.load %arg4[%c0_7, %c0_8] : memref<384x256xbf16, #tpu.memory_space<vmem>>, vector<384x256xbf16>
    %cst_9 = arith.constant dense<0.000000e+00> : vector<256x256xf32>
    %16 = tpu.matmul %14, %15, %cst_9 {dimension_numbers = #tpu.dot_dimension_numbers<[1], [0], [0], [1], [0, 0, 1, 1], [], []>} : vector<256x384xbf16>, vector<384x256xbf16>, vector<256x256xf32> -> vector<256x256xf32>
    %c0_10 = arith.constant 0 : index
    %c0_11 = arith.constant 0 : index
    %17 = vector.load %arg5[%c0_10, %c0_11] : memref<1x256xf32, #tpu.memory_space<vmem>>, vector<1x256xf32>
    %18 = vector.broadcast %17 : vector<1x256xf32> to vector<256x256xf32>
    %19 = arith.addf %16, %18 : vector<256x256xf32>
    %cst_12 = arith.constant 0.000000e+00 : f32
    %20 = vector.broadcast %cst_12 : f32 to vector<256x256xf32>
    %21 = arith.maximumf %19, %20 : vector<256x256xf32>
    %22 = arith.truncf %21 : vector<256x256xf32> to vector<256x256xbf16>
    %c0_13 = arith.constant 0 : index
    %c0_14 = arith.constant 0 : index
    %23 = vector.load %arg11[%c0_13, %c0_14] : memref<256x256xbf16, #tpu.memory_space<vmem>>, vector<256x256xbf16>
    tpu.vector_store %arg11[%c0_13, %c0_14], %22 {strides = array<i32>} : memref<256x256xbf16, #tpu.memory_space<vmem>>, vector<256x256xbf16>,
    %c0_15 = arith.constant 0 : index
    %c0_16 = arith.constant 0 : index
    %24 = vector.load %arg11[%c0_15, %c0_16] : memref<256x256xbf16, #tpu.memory_space<vmem>>, vector<16x256xbf16>
    %c0_17 = arith.constant 0 : index
    %c0_18 = arith.constant 0 : index
    %c0_19 = arith.constant 0 : index
    %25 = vector.load %arg6[%c0_17, %c0_18, %c0_19] : memref<16x256x128xbf16, #tpu.memory_space<vmem>>, vector<1x256x128xbf16>
    %26 = vector.shape_cast %25 : vector<1x256x128xbf16> to vector<256x128xbf16>
    %cst_20 = arith.constant dense<0.000000e+00> : vector<16x128xf32>
    %27 = tpu.matmul %24, %26, %cst_20 {dimension_numbers = #tpu.dot_dimension_numbers<[1], [0], [0], [1], [0, 0, 1, 1], [], []>} : vector<16x256xbf16>, vector<256x128xbf16>, vector<16x128xf32> -> vector<16x128xf32>
    %c16 = arith.constant 16 : index
    %c0_21 = arith.constant 0 : index
    %28 = vector.load %arg11[%c16, %c0_21] : memref<256x256xbf16, #tpu.memory_space<vmem>>, vector<16x256xbf16>
    %c1 = arith.constant 1 : index
    %c0_22 = arith.constant 0 : index
    %c0_23 = arith.constant 0 : index
    %29 = vector.load %arg6[%c1, %c0_22, %c0_23] : memref<16x256x128xbf16, #tpu.memory_space<vmem>>, vector<1x256x128xbf16>
    %30 = vector.shape_cast %29 : vector<1x256x128xbf16> to vector<256x128xbf16>
    %cst_24 = arith.constant dense<0.000000e+00> : vector<16x128xf32>
    %31 = tpu.matmul %28, %30, %cst_24 {dimension_numbers = #tpu.dot_dimension_numbers<[1], [0], [0], [1], [0, 0, 1, 1], [], []>} : vector<16x256xbf16>, vector<256x128xbf16>, vector<16x128xf32> -> vector<16x128xf32>
    %32 = arith.addf %27, %31 : vector<16x128xf32>
    %c32 = arith.constant 32 : index
    %c0_25 = arith.constant 0 : index
    %33 = vector.load %arg11[%c32, %c0_25] : memref<256x256xbf16, #tpu.memory_space<vmem>>, vector<16x256xbf16>
    %c2 = arith.constant 2 : index
    %c0_26 = arith.constant 0 : index
    %c0_27 = arith.constant 0 : index
    %34 = vector.load %arg6[%c2, %c0_26, %c0_27] : memref<16x256x128xbf16, #tpu.memory_space<vmem>>, vector<1x256x128xbf16>
    %35 = vector.shape_cast %34 : vector<1x256x128xbf16> to vector<256x128xbf16>
    %cst_28 = arith.constant dense<0.000000e+00> : vector<16x128xf32>
    %36 = tpu.matmul %33, %35, %cst_28 {dimension_numbers = #tpu.dot_dimension_numbers<[1], [0], [0], [1], [0, 0, 1, 1], [], []>} : vector<16x256xbf16>, vector<256x128xbf16>, vector<16x128xf32> -> vector<16x128xf32>
    %37 = arith.addf %32, %36 : vector<16x128xf32>
    %c48 = arith.constant 48 : index
    %c0_29 = arith.constant 0 : index
    %38 = vector.load %arg11[%c48, %c0_29] : memref<256x256xbf16, #tpu.memory_space<vmem>>, vector<16x256xbf16>
    %c3 = arith.constant 3 : index
    %c0_30 = arith.constant 0 : index
    %c0_31 = arith.constant 0 : index
    %39 = vector.load %arg6[%c3, %c0_30, %c0_31] : memref<16x256x128xbf16, #tpu.memory_space<vmem>>, vector<1x256x128xbf16>
    %40 = vector.shape_cast %39 : vector<1x256x128xbf16> to vector<256x128xbf16>
    %cst_32 = arith.constant dense<0.000000e+00> : vector<16x128xf32>
    %41 = tpu.matmul %38, %40, %cst_32 {dimension_numbers = #tpu.dot_dimension_numbers<[1], [0], [0], [1], [0, 0, 1, 1], [], []>} : vector<16x256xbf16>, vector<256x128xbf16>, vector<16x128xf32> -> vector<16x128xf32>
    %42 = arith.addf %37, %41 : vector<16x128xf32>
    %c64 = arith.constant 64 : index
    %c0_33 = arith.constant 0 : index
    %43 = vector.load %arg11[%c64, %c0_33] : memref<256x256xbf16, #tpu.memory_space<vmem>>, vector<16x256xbf16>
    %c4 = arith.constant 4 : index
    %c0_34 = arith.constant 0 : index
    %c0_35 = arith.constant 0 : index
    %44 = vector.load %arg6[%c4, %c0_34, %c0_35] : memref<16x256x128xbf16, #tpu.memory_space<vmem>>, vector<1x256x128xbf16>
    %45 = vector.shape_cast %44 : vector<1x256x128xbf16> to vector<256x128xbf16>
    %cst_36 = arith.constant dense<0.000000e+00> : vector<16x128xf32>
    %46 = tpu.matmul %43, %45, %cst_36 {dimension_numbers = #tpu.dot_dimension_numbers<[1], [0], [0], [1], [0, 0, 1, 1], [], []>} : vector<16x256xbf16>, vector<256x128xbf16>, vector<16x128xf32> -> vector<16x128xf32>
    %47 = arith.addf %42, %46 : vector<16x128xf32>
    %c80 = arith.constant 80 : index
    %c0_37 = arith.constant 0 : index
    %48 = vector.load %arg11[%c80, %c0_37] : memref<256x256xbf16, #tpu.memory_space<vmem>>, vector<16x256xbf16>
    %c5 = arith.constant 5 : index
    %c0_38 = arith.constant 0 : index
    %c0_39 = arith.constant 0 : index
    %49 = vector.load %arg6[%c5, %c0_38, %c0_39] : memref<16x256x128xbf16, #tpu.memory_space<vmem>>, vector<1x256x128xbf16>
    %50 = vector.shape_cast %49 : vector<1x256x128xbf16> to vector<256x128xbf16>
    %cst_40 = arith.constant dense<0.000000e+00> : vector<16x128xf32>
    %51 = tpu.matmul %48, %50, %cst_40 {dimension_numbers = #tpu.dot_dimension_numbers<[1], [0], [0], [1], [0, 0, 1, 1], [], []>} : vector<16x256xbf16>, vector<256x128xbf16>, vector<16x128xf32> -> vector<16x128xf32>
    %52 = arith.addf %47, %51 : vector<16x128xf32>
    %c96 = arith.constant 96 : index
    %c0_41 = arith.constant 0 : index
    %53 = vector.load %arg11[%c96, %c0_41] : memref<256x256xbf16, #tpu.memory_space<vmem>>, vector<16x256xbf16>
    %c6 = arith.constant 6 : index
    %c0_42 = arith.constant 0 : index
    %c0_43 = arith.constant 0 : index
    %54 = vector.load %arg6[%c6, %c0_42, %c0_43] : memref<16x256x128xbf16, #tpu.memory_space<vmem>>, vector<1x256x128xbf16>
    %55 = vector.shape_cast %54 : vector<1x256x128xbf16> to vector<256x128xbf16>
    %cst_44 = arith.constant dense<0.000000e+00> : vector<16x128xf32>
    %56 = tpu.matmul %53, %55, %cst_44 {dimension_numbers = #tpu.dot_dimension_numbers<[1], [0], [0], [1], [0, 0, 1, 1], [], []>} : vector<16x256xbf16>, vector<256x128xbf16>, vector<16x128xf32> -> vector<16x128xf32>
    %57 = arith.addf %52, %56 : vector<16x128xf32>
    %c112 = arith.constant 112 : index
    %c0_45 = arith.constant 0 : index
    %58 = vector.load %arg11[%c112, %c0_45] : memref<256x256xbf16, #tpu.memory_space<vmem>>, vector<16x256xbf16>
    %c7 = arith.constant 7 : index
    %c0_46 = arith.constant 0 : index
    %c0_47 = arith.constant 0 : index
    %59 = vector.load %arg6[%c7, %c0_46, %c0_47] : memref<16x256x128xbf16, #tpu.memory_space<vmem>>, vector<1x256x128xbf16>
    %60 = vector.shape_cast %59 : vector<1x256x128xbf16> to vector<256x128xbf16>
    %cst_48 = arith.constant dense<0.000000e+00> : vector<16x128xf32>
    %61 = tpu.matmul %58, %60, %cst_48 {dimension_numbers = #tpu.dot_dimension_numbers<[1], [0], [0], [1], [0, 0, 1, 1], [], []>} : vector<16x256xbf16>, vector<256x128xbf16>, vector<16x128xf32> -> vector<16x128xf32>
    %62 = arith.addf %57, %61 : vector<16x128xf32>
    %c128 = arith.constant 128 : index
    %c0_49 = arith.constant 0 : index
    %63 = vector.load %arg11[%c128, %c0_49] : memref<256x256xbf16, #tpu.memory_space<vmem>>, vector<16x256xbf16>
    %c8 = arith.constant 8 : index
    %c0_50 = arith.constant 0 : index
    %c0_51 = arith.constant 0 : index
    %64 = vector.load %arg6[%c8, %c0_50, %c0_51] : memref<16x256x128xbf16, #tpu.memory_space<vmem>>, vector<1x256x128xbf16>
    %65 = vector.shape_cast %64 : vector<1x256x128xbf16> to vector<256x128xbf16>
    %cst_52 = arith.constant dense<0.000000e+00> : vector<16x128xf32>
    %66 = tpu.matmul %63, %65, %cst_52 {dimension_numbers = #tpu.dot_dimension_numbers<[1], [0], [0], [1], [0, 0, 1, 1], [], []>} : vector<16x256xbf16>, vector<256x128xbf16>, vector<16x128xf32> -> vector<16x128xf32>
    %67 = arith.addf %62, %66 : vector<16x128xf32>
    %c144 = arith.constant 144 : index
    %c0_53 = arith.constant 0 : index
    %68 = vector.load %arg11[%c144, %c0_53] : memref<256x256xbf16, #tpu.memory_space<vmem>>, vector<16x256xbf16>
    %c9 = arith.constant 9 : index
    %c0_54 = arith.constant 0 : index
    %c0_55 = arith.constant 0 : index
    %69 = vector.load %arg6[%c9, %c0_54, %c0_55] : memref<16x256x128xbf16, #tpu.memory_space<vmem>>, vector<1x256x128xbf16>
    %70 = vector.shape_cast %69 : vector<1x256x128xbf16> to vector<256x128xbf16>
    %cst_56 = arith.constant dense<0.000000e+00> : vector<16x128xf32>
    %71 = tpu.matmul %68, %70, %cst_56 {dimension_numbers = #tpu.dot_dimension_numbers<[1], [0], [0], [1], [0, 0, 1, 1], [], []>} : vector<16x256xbf16>, vector<256x128xbf16>, vector<16x128xf32> -> vector<16x128xf32>
    %72 = arith.addf %67, %71 : vector<16x128xf32>
    %c160 = arith.constant 160 : index
    %c0_57 = arith.constant 0 : index
    %73 = vector.load %arg11[%c160, %c0_57] : memref<256x256xbf16, #tpu.memory_space<vmem>>, vector<16x256xbf16>
    %c10 = arith.constant 10 : index
    %c0_58 = arith.constant 0 : index
    %c0_59 = arith.constant 0 : index
    %74 = vector.load %arg6[%c10, %c0_58, %c0_59] : memref<16x256x128xbf16, #tpu.memory_space<vmem>>, vector<1x256x128xbf16>
    %75 = vector.shape_cast %74 : vector<1x256x128xbf16> to vector<256x128xbf16>
    %cst_60 = arith.constant dense<0.000000e+00> : vector<16x128xf32>
    %76 = tpu.matmul %73, %75, %cst_60 {dimension_numbers = #tpu.dot_dimension_numbers<[1], [0], [0], [1], [0, 0, 1, 1], [], []>} : vector<16x256xbf16>, vector<256x128xbf16>, vector<16x128xf32> -> vector<16x128xf32>
    %77 = arith.addf %72, %76 : vector<16x128xf32>
    %c176 = arith.constant 176 : index
    %c0_61 = arith.constant 0 : index
    %78 = vector.load %arg11[%c176, %c0_61] : memref<256x256xbf16, #tpu.memory_space<vmem>>, vector<16x256xbf16>
    %c11 = arith.constant 11 : index
    %c0_62 = arith.constant 0 : index
    %c0_63 = arith.constant 0 : index
    %79 = vector.load %arg6[%c11, %c0_62, %c0_63] : memref<16x256x128xbf16, #tpu.memory_space<vmem>>, vector<1x256x128xbf16>
    %80 = vector.shape_cast %79 : vector<1x256x128xbf16> to vector<256x128xbf16>
    %cst_64 = arith.constant dense<0.000000e+00> : vector<16x128xf32>
    %81 = tpu.matmul %78, %80, %cst_64 {dimension_numbers = #tpu.dot_dimension_numbers<[1], [0], [0], [1], [0, 0, 1, 1], [], []>} : vector<16x256xbf16>, vector<256x128xbf16>, vector<16x128xf32> -> vector<16x128xf32>
    %82 = arith.addf %77, %81 : vector<16x128xf32>
    %c192 = arith.constant 192 : index
    %c0_65 = arith.constant 0 : index
    %83 = vector.load %arg11[%c192, %c0_65] : memref<256x256xbf16, #tpu.memory_space<vmem>>, vector<16x256xbf16>
    %c12 = arith.constant 12 : index
    %c0_66 = arith.constant 0 : index
    %c0_67 = arith.constant 0 : index
    %84 = vector.load %arg6[%c12, %c0_66, %c0_67] : memref<16x256x128xbf16, #tpu.memory_space<vmem>>, vector<1x256x128xbf16>
    %85 = vector.shape_cast %84 : vector<1x256x128xbf16> to vector<256x128xbf16>
    %cst_68 = arith.constant dense<0.000000e+00> : vector<16x128xf32>
    %86 = tpu.matmul %83, %85, %cst_68 {dimension_numbers = #tpu.dot_dimension_numbers<[1], [0], [0], [1], [0, 0, 1, 1], [], []>} : vector<16x256xbf16>, vector<256x128xbf16>, vector<16x128xf32> -> vector<16x128xf32>
    %87 = arith.addf %82, %86 : vector<16x128xf32>
    %c208 = arith.constant 208 : index
    %c0_69 = arith.constant 0 : index
    %88 = vector.load %arg11[%c208, %c0_69] : memref<256x256xbf16, #tpu.memory_space<vmem>>, vector<16x256xbf16>
    %c13 = arith.constant 13 : index
    %c0_70 = arith.constant 0 : index
    %c0_71 = arith.constant 0 : index
    %89 = vector.load %arg6[%c13, %c0_70, %c0_71] : memref<16x256x128xbf16, #tpu.memory_space<vmem>>, vector<1x256x128xbf16>
    %90 = vector.shape_cast %89 : vector<1x256x128xbf16> to vector<256x128xbf16>
    %cst_72 = arith.constant dense<0.000000e+00> : vector<16x128xf32>
    %91 = tpu.matmul %88, %90, %cst_72 {dimension_numbers = #tpu.dot_dimension_numbers<[1], [0], [0], [1], [0, 0, 1, 1], [], []>} : vector<16x256xbf16>, vector<256x128xbf16>, vector<16x128xf32> -> vector<16x128xf32>
    %92 = arith.addf %87, %91 : vector<16x128xf32>
    %c224 = arith.constant 224 : index
    %c0_73 = arith.constant 0 : index
    %93 = vector.load %arg11[%c224, %c0_73] : memref<256x256xbf16, #tpu.memory_space<vmem>>, vector<16x256xbf16>
    %c14 = arith.constant 14 : index
    %c0_74 = arith.constant 0 : index
    %c0_75 = arith.constant 0 : index
    %94 = vector.load %arg6[%c14, %c0_74, %c0_75] : memref<16x256x128xbf16, #tpu.memory_space<vmem>>, vector<1x256x128xbf16>
    %95 = vector.shape_cast %94 : vector<1x256x128xbf16> to vector<256x128xbf16>
    %cst_76 = arith.constant dense<0.000000e+00> : vector<16x128xf32>
    %96 = tpu.matmul %93, %95, %cst_76 {dimension_numbers = #tpu.dot_dimension_numbers<[1], [0], [0], [1], [0, 0, 1, 1], [], []>} : vector<16x256xbf16>, vector<256x128xbf16>, vector<16x128xf32> -> vector<16x128xf32>
    %97 = arith.addf %92, %96 : vector<16x128xf32>
    %c240 = arith.constant 240 : index
    %c0_77 = arith.constant 0 : index
    %98 = vector.load %arg11[%c240, %c0_77] : memref<256x256xbf16, #tpu.memory_space<vmem>>, vector<16x256xbf16>
    %c15 = arith.constant 15 : index
    %c0_78 = arith.constant 0 : index
    %c0_79 = arith.constant 0 : index
    %99 = vector.load %arg6[%c15, %c0_78, %c0_79] : memref<16x256x128xbf16, #tpu.memory_space<vmem>>, vector<1x256x128xbf16>
    %100 = vector.shape_cast %99 : vector<1x256x128xbf16> to vector<256x128xbf16>
    %cst_80 = arith.constant dense<0.000000e+00> : vector<16x128xf32>
    %101 = tpu.matmul %98, %100, %cst_80 {dimension_numbers = #tpu.dot_dimension_numbers<[1], [0], [0], [1], [0, 0, 1, 1], [], []>} : vector<16x256xbf16>, vector<256x128xbf16>, vector<16x128xf32> -> vector<16x128xf32>
    %102 = arith.addf %97, %101 : vector<16x128xf32>
    %c0_81 = arith.constant 0 : index
    %c0_82 = arith.constant 0 : index
    %103 = vector.load %arg7[%c0_81, %c0_82] : memref<1x128xf32, #tpu.memory_space<vmem>>, vector<1x128xf32>
    %104 = vector.broadcast %103 : vector<1x128xf32> to vector<16x128xf32>
    %105 = arith.addf %102, %104 : vector<16x128xf32>
    %cst_83 = arith.constant 0.000000e+00 : f32
    %106 = vector.broadcast %cst_83 : f32 to vector<16x128xf32>
    %107 = arith.maximumf %105, %106 : vector<16x128xf32>
    %108 = arith.truncf %107 : vector<16x128xf32> to vector<16x128xbf16>
    %c0_84 = arith.constant 0 : index
    %c0_85 = arith.constant 0 : index
    %109 = vector.load %arg8[%c0_84, %c0_85] : memref<128x128xbf16, #tpu.memory_space<vmem>>, vector<128x128xbf16>
    %cst_86 = arith.constant dense<0.000000e+00> : vector<16x128xf32>
    %110 = tpu.matmul %108, %109, %cst_86 {dimension_numbers = #tpu.dot_dimension_numbers<[1], [0], [0], [1], [0, 0, 1, 1], [], []>} : vector<16x128xbf16>, vector<128x128xbf16>, vector<16x128xf32> -> vector<16x128xf32>
    %c0_87 = arith.constant 0 : index
    %c0_88 = arith.constant 0 : index
    %111 = vector.load %arg9[%c0_87, %c0_88] : memref<1x128xf32, #tpu.memory_space<vmem>>, vector<1x128xf32>
    %112 = vector.broadcast %111 : vector<1x128xf32> to vector<16x128xf32>
    %113 = arith.addf %110, %112 : vector<16x128xf32>
    %c0_89 = arith.constant 0 : index
    %c0_90 = arith.constant 0 : index
    %114 = vector.load %arg10[%c0_89, %c0_90] : memref<16x128xf32, #tpu.memory_space<vmem>>, vector<16x128xf32>
    tpu.vector_store %arg10[%c0_89, %c0_90], %113 {strides = array<i32>} : memref<16x128xf32, #tpu.memory_space<vmem>>, vector<16x128xf32>,
    return
  }
  func.func @transform_0(%arg0: i32) -> (i32, i32) {
    %c0_i32 = arith.constant 0 : i32
    %c0_i32_0 = arith.constant 0 : i32
    return %arg0, %c0_i32 : i32, i32
  }
  func.func @transform_1(%arg0: i32) -> (i32, i32) {
    %c0_i32 = arith.constant 0 : i32
    %c0_i32_0 = arith.constant 0 : i32
    %c0_i32_1 = arith.constant 0 : i32
    return %c0_i32, %c0_i32_0 : i32, i32
  }
  func.func @transform_2(%arg0: i32) -> (i32, i32) {
    %c0_i32 = arith.constant 0 : i32
    %c0_i32_0 = arith.constant 0 : i32
    %c0_i32_1 = arith.constant 0 : i32
    return %c0_i32, %c0_i32_0 : i32, i32
  }
  func.func @transform_3(%arg0: i32) -> (i32, i32) {
    %c0_i32 = arith.constant 0 : i32
    %c0_i32_0 = arith.constant 0 : i32
    %c0_i32_1 = arith.constant 0 : i32
    return %c0_i32, %c0_i32_0 : i32, i32
  }
  func.func @transform_4(%arg0: i32) -> (i32, i32) {
    %c0_i32 = arith.constant 0 : i32
    %c0_i32_0 = arith.constant 0 : i32
    %c0_i32_1 = arith.constant 0 : i32
    return %c0_i32, %c0_i32_0 : i32, i32
  }
  func.func @transform_5(%arg0: i32) -> (i32, i32, i32) {
    %c0_i32 = arith.constant 0 : i32
    %c0_i32_0 = arith.constant 0 : i32
    %c0_i32_1 = arith.constant 0 : i32
    %c0_i32_2 = arith.constant 0 : i32
    return %c0_i32, %c0_i32_0, %c0_i32_1 : i32, i32, i32
  }
  func.func @transform_6(%arg0: i32) -> (i32, i32) {
    %c0_i32 = arith.constant 0 : i32
    %c0_i32_0 = arith.constant 0 : i32
    %c0_i32_1 = arith.constant 0 : i32
    return %c0_i32, %c0_i32_0 : i32, i32
  }
  func.func @transform_7(%arg0: i32) -> (i32, i32) {
    %c0_i32 = arith.constant 0 : i32
    %c0_i32_0 = arith.constant 0 : i32
    %c0_i32_1 = arith.constant 0 : i32
    return %c0_i32, %c0_i32_0 : i32, i32
  }
  func.func @transform_8(%arg0: i32) -> (i32, i32) {
    %c0_i32 = arith.constant 0 : i32
    %c0_i32_0 = arith.constant 0 : i32
    %c0_i32_1 = arith.constant 0 : i32
    return %c0_i32, %c0_i32_0 : i32, i32
  }
  func.func @transform_9(%arg0: i32) -> (i32, i32) {
    %c0_i32 = arith.constant 0 : i32
    %c0_i32_0 = arith.constant 0 : i32
    return %arg0, %c0_i32 : i32, i32
  }
}

</mosaic_0001>

<bundles_post_ra>
// kernel: tpu_custom_call.1
= control target key start
LH: loop header
LB: loop body
LE: loop exit
PB: predicated region body
PF: predicated region fallthrough
CT: control target
= control target key end

     0   :  { %14 = vsyncpa [#allocation4], 0  ;;  %s6676_s0 = inlined_call_operand.vmem [shape: bf16[256,192], index: 0, kind: input, shape index: {}]   ;;  %s6677_s1 = inlined_call_operand.hbm [shape: bf16[192,128], index: 1, kind: input, shape index: {}]   ;;  %s6678_s2 = inlined_call_operand.vmem [shape: f32[1,128], index: 2, kind: input, shape index: {}]   ;;  %s6679_s3 = inlined_call_operand.vmem [shape: bf16[384,256], index: 3, kind: input, shape index: {}]   ;;  %s6680_s4 = inlined_call_operand.vmem [shape: f32[1,256], index: 4, kind: input, shape index: {}]   ;;  %s6681_s5 = inlined_call_operand.hbm [shape: bf16[16,256,128], index: 5, kind: input, shape index: {}]   ;;  %s6682_s6 = inlined_call_operand.vmem [shape: f32[1,128], index: 6, kind: input, shape index: {}]   ;;  %s6683_s7 = inlined_call_operand.vmem [shape: bf16[128,128], index: 7, kind: input, shape index: {}]   ;;  %s6684_s8 = inlined_call_operand.vmem [shape: f32[1,128], index: 8, kind: input, shape index: {}]   ;;  %s6685_s9 = inlined_call_operand.hbm [shape: f32[16,128], index: 9, kind: output, shape index: {}]  }
   0x1   :  { %15 = vsyncpa [#allocation7], 0 }
   0x2   :  { %16 = vsyncpa [#allocation5], 0  ;;  %s6012_s30 = smov [#allocation3]  }
   0x3   :  { %s24_s10 = sshll.u32 %s6012_s30, 4  ;;  %s25_s10 = int_to_ptr.vmem [resolvable:$true] %s24_s10 }
   0x4   :  { %s5954_s11 = scalar_lea.vmem %s25_s10, 1536  ;;  %p5959_p1 = scmp.lt.s32.totalorder %s25_s10, %s25_s10 }
   0x5   :  { %p5955_p0 = scmp.ne.s32.totalorder %s25_s10, %s5954_s11  ;;  %p5960_p2 = scmp.lt.s32.totalorder %s5954_s11, %s5954_s11 }
   0x7   :  { %p5961_p3 = por %p5960_p2, %p5959_p1 }
   0x9   :  { %p5962_p4 = pnand %p5961_p3, %p5955_p0 }
   0xb   :  { %5965 = shalt.err (!%p5962_p4)
}
   0xc   :  { %s6013_s12 = smov 64   ;;  %s6014_s13 = smov 4  }
   0xd   :  { %30 = dma.hbm_to_vmem [thread:$0]  %s6677_s1, 1536, %s25_s10, [#allocation4], %s6013_s12, %s6013_s12, %s6014_s13  }
   0xe   :  { %s6015_s16 = smov [#allocation6]  }
   0xf   :  { %s42_s17 = sshll.u32 %s6015_s16, 4  ;;  %s43_s17 = int_to_ptr.vmem [resolvable:$true] %s42_s17 }
  0x10   :  { %s5974_s18 = scalar_lea.vmem %s43_s17, 32768  ;;  %p5979_p6 = scmp.lt.s32.totalorder %s43_s17, %s43_s17 }
  0x11   :  { %p5975_p5 = scmp.ne.s32.totalorder %s43_s17, %s5974_s18  ;;  %p5980_p7 = scmp.lt.s32.totalorder %s5974_s18, %s5974_s18 }
  0x13   :  { %p5981_p8 = por %p5980_p7, %p5979_p6 }
  0x15   :  { %p5982_p9 = pnand %p5981_p8, %p5975_p5 }
  0x17   :  { %5985 = shalt.err (!%p5982_p9)
}
  0x18   :  { %48 = dma.hbm_to_vmem [thread:$0]  %s6681_s5, 32768, %s43_s17, [#allocation7], %s6013_s12, %s6013_s12, %s6014_s13  }
  0x19   :  { %6006 = dma.done.wait [#allocation4], 1536  }
  0x1a   :  { %6007 = vsyncadd [#allocation4], 4294965760 }
  0x1b   :  { %6008 = dma.done.wait [#allocation7], 32768  }
  0x1c   :  { %6009 = vsyncadd [#allocation7], 4294934528  ;;  %v6016_v0 = vmov 0   ;;  %v5550_v1 = vld [vmem:[#allocation3 + $0x38] sm:$0xff]   ;;  %v5551_v2 = vld [vmem:[#allocation3 + $0x30] sm:$0xff]   ;;  %vm341_vm0 = vcmask 523264  }
  0x1d   :  { %390 = vmatprep.subr.bf16.mxu0 %v6016_v0  ;;  %v5552_v3 = vld [vmem:[#allocation3 + $0x28] sm:$0xff]   ;;  %v5553_v4 = vld [vmem:[#allocation3 + $0x20] sm:$0xff]   ;;  %v5554_v6 = vld [vmem:[#allocation3 + $0x18] sm:$0xff]   ;;  %vm6018_vm1 = vmmov 0   ;;  %s6019_s15 = smov [#allocation8]  }
  0x1e   :  { %391 = vmatpush1.bf16.msra.mxu0 %v5550_v1  ;;  %v5564_v5 = vld [vmem:[%s6676_s0 + $0x4] ss:$8 sps:$4 sm:$0xff]   ;;  %v5555_v7 = vld [vmem:[#allocation3 + $0x10] sm:$0xff]   ;;  %v5558_v10 = vld [vmem:[#allocation3 + $0x58] sm:$0xff]   ;;  %s4643_s16 = sshll.u32 %s6019_s15, 4  ;;  %s4644_s16 = int_to_ptr.vmem [resolvable:$true] %s4643_s16 }
  0x1f   :  { %392 = vmatprep.subr.bf16.mxu0 %v6016_v0  ;;  %4701 = vmatprep.mubr.msk.bf16.mxu0 %vm341_vm0, %v5564_v5  ;;  %v5556_v8 = vld [vmem:[#allocation3 + $0x8] sm:$0xff]   ;;  %v5557_v9 = vld [vmem:[#allocation3] sm:$0xff]   ;;  %v5559_v11 = vld [vmem:[#allocation3 + $0x50] sm:$0xff]   ;;  %p5991_p11 = scmp.lt.s32.totalorder %s4644_s16, %s4644_s16 }
  0x20   :  { %v5610_v12 = vld [vmem:[%s6679_s3 + $0x74] ss:$8 sps:$4 sm:$0xff]   ;;  %v5612_v13 = vld [vmem:[%s6679_s3 + $0x70] ss:$8 sps:$4 sm:$0xff]   ;;  %v5613_v14 = vld [vmem:[%s6679_s3 + $0x64] ss:$8 sps:$4 sm:$0xff]  }
  0x21   :  { %899 = vmatprep.subr.bf16.mxu1 %v5610_v12  ;;  %v5615_v15 = vld [vmem:[%s6679_s3 + $0x60] ss:$8 sps:$4 sm:$0xff]   ;;  %v5619_v17 = vld [vmem:[%s6679_s3 + $0x54] ss:$8 sps:$4 sm:$0xff]   ;;  %v5621_v18 = vld [vmem:[%s6679_s3 + $0x50] ss:$8 sps:$4 sm:$0xff]  }
  0x22   :  { %393 = vmatpush1.bf16.msra.mxu0 %v5551_v2  ;;  %900 = vmatpush1.bf16.msra.mxu1 %v5612_v13  ;;  %v5560_v16 = vld [vmem:[#allocation3 + $0x48] sm:$0xff]   ;;  %v5561_v19 = vld [vmem:[#allocation3 + $0x40] sm:$0xff]   ;;  %v5588_v21 = vld [vmem:[%s6679_s3 + $0x174] ss:$8 sps:$4 sm:$0xff]  }
  0x23   :  { %394 = vmatprep.subr.bf16.mxu0 %v6016_v0  ;;  %901 = vmatprep.subr.bf16.mxu1 %v5613_v14  ;;  %v5622_v20 = vld [vmem:[%s6679_s3 + $0x44] ss:$8 sps:$4 sm:$0xff]   ;;  %v5562_v22 = vld [vmem:[%s6676_s0] ss:$8 sps:$4 sm:$0xff]   ;;  %v5565_v24 = vld [vmem:[%s6676_s0 + $0x14] ss:$8 sps:$4 sm:$0xff]  }
  0x24   :  { %v5624_v23 = vld [vmem:[%s6679_s3 + $0x40] ss:$8 sps:$4 sm:$0xff]   ;;  %v5586_v25 = vld [vmem:[%s6679_s3 + $0x170] ss:$8 sps:$4 sm:$0xff]   ;;  %v5594_v26 = vld [vmem:[%s6679_s3 + $0x164] ss:$8 sps:$4 sm:$0xff]  }
  0x25   :  { %v5628_v27 = vld [vmem:[%s6679_s3 + $0x34] ss:$8 sps:$4 sm:$0xff]   ;;  %v5630_v28 = vld [vmem:[%s6679_s3 + $0x30] ss:$8 sps:$4 sm:$0xff]   ;;  %v5592_v29 = vld [vmem:[%s6679_s3 + $0x160] ss:$8 sps:$4 sm:$0xff]  }
  0x26   :  { %395 = vmatpush1.bf16.msra.mxu0 %v5552_v3  ;;  %902 = vmatpush1.bf16.msra.mxu1 %v5615_v15  ;;  %v5631_v30 = vld [vmem:[%s6679_s3 + $0x24] ss:$8 sps:$4 sm:$0xff]   ;;  %v5567_v31 = vld [vmem:[%s6676_s0 + $0x10] ss:$8 sps:$4 sm:$0xff]   ;;  %v5600_v32 = vld [vmem:[%s6679_s3 + $0x154] ss:$8 sps:$4 sm:$0xff]  }
  0x27   :  { %396 = vmatprep.subr.bf16.mxu0 %v6016_v0  ;;  %903 = vmatprep.subr.bf16.mxu1 %v5619_v17  ;;  %v5568_v33 = vld [vmem:[%s6676_s0 + $0x24] ss:$8 sps:$4 sm:$0xff]   ;;  %v5633_v34 = vld [vmem:[%s6679_s3 + $0x20] ss:$8 sps:$4 sm:$0xff]   ;;  %v5598_v35 = vld [vmem:[%s6679_s3 + $0x150] ss:$8 sps:$4 sm:$0xff]  }
  0x28   :  { %v5606_v36 = vld [vmem:[%s6679_s3 + $0x144] ss:$8 sps:$4 sm:$0xff]   ;;  %v5640_v37 = vld [vmem:[%s6679_s3 + $0x14] ss:$8 sps:$4 sm:$0xff]   ;;  %v5642_v38 = vld [vmem:[%s6679_s3 + $0x10] ss:$8 sps:$4 sm:$0xff]  }
  0x29   :  { %v5604_v39 = vld [vmem:[%s6679_s3 + $0x140] ss:$8 sps:$4 sm:$0xff]   ;;  %v5643_v40 = vld [vmem:[%s6679_s3 + $0x4] ss:$8 sps:$4 sm:$0xff]   ;;  %v5618_v42 = vld [vmem:[%s6679_s3 + $0x134] ss:$8 sps:$4 sm:$0xff]  }
  0x2a   :  { %397 = vmatpush1.bf16.msra.mxu0 %v5553_v4  ;;  %904 = vmatpush1.bf16.msra.mxu1 %v5621_v18  ;;  %v5570_v41 = vld [vmem:[%s6676_s0 + $0x20] ss:$8 sps:$4 sm:$0xff]   ;;  %v5571_v43 = vld [vmem:[%s6676_s0 + $0x34] ss:$8 sps:$4 sm:$0xff]   ;;  %v5616_v44 = vld [vmem:[%s6679_s3 + $0x130] ss:$8 sps:$4 sm:$0xff]  }
  0x2b   :  { %398 = vmatprep.subr.bf16.mxu0 %v6016_v0  ;;  %905 = vmatprep.subr.bf16.mxu1 %v5622_v20  ;;  %v5645_v45 = vld [vmem:[%s6679_s3] ss:$8 sps:$4 sm:$0xff]   ;;  %v5638_v46 = vld [vmem:[%s6679_s3 + $0x124] ss:$8 sps:$4 sm:$0xff]   ;;  %v5649_v47 = vld [vmem:[%s6679_s3 + $0xf4] ss:$8 sps:$4 sm:$0xff]  }
  0x2c   :  { %v5651_v48 = vld [vmem:[%s6679_s3 + $0xf0] ss:$8 sps:$4 sm:$0xff]   ;;  %v5636_v49 = vld [vmem:[%s6679_s3 + $0x120] ss:$8 sps:$4 sm:$0xff]   ;;  %v5652_v50 = vld [vmem:[%s6679_s3 + $0xe4] ss:$8 sps:$4 sm:$0xff]  }
  0x2d   :  { %v5659_v51 = vld [vmem:[%s6679_s3 + $0x114] ss:$8 sps:$4 sm:$0xff]   ;;  %v5573_v52 = vld [vmem:[%s6676_s0 + $0x30] ss:$8 sps:$4 sm:$0xff]   ;;  %v5654_v53 = vld [vmem:[%s6679_s3 + $0xe0] ss:$8 sps:$4 sm:$0xff]  }
  0x2e   :  { %399 = vmatpush1.bf16.msra.mxu0 %v5554_v6  ;;  %906 = vmatpush1.bf16.msra.mxu1 %v5624_v23  ;;  %v5574_v54 = vld [vmem:[%s6676_s0 + $0x44] ss:$8 sps:$4 sm:$0xff]   ;;  %v5657_v55 = vld [vmem:[%s6679_s3 + $0x110] ss:$8 sps:$4 sm:$0xff]   ;;  %v5661_v56 = vld [vmem:[%s6679_s3 + $0xd4] ss:$8 sps:$4 sm:$0xff]  }
  0x2f   :  { %400 = vmatprep.subr.bf16.mxu0 %v6016_v0  ;;  %907 = vmatprep.subr.bf16.mxu1 %v5628_v27  ;;  %v5663_v57 = vld [vmem:[%s6679_s3 + $0xd0] ss:$8 sps:$4 sm:$0xff]   ;;  %v5664_v58 = vld [vmem:[%s6679_s3 + $0xc4] ss:$8 sps:$4 sm:$0xff]   ;;  %v5576_v59 = vld [vmem:[%s6676_s0 + $0x40] ss:$8 sps:$4 sm:$0xff]  }
  0x30   :  { %v5666_v60 = vld [vmem:[%s6679_s3 + $0xc0] ss:$8 sps:$4 sm:$0xff]   ;;  %v5577_v61 = vld [vmem:[%s6676_s0 + $0x54] ss:$8 sps:$4 sm:$0xff]   ;;  %v5669_v63 = vld [vmem:[%s6679_s3 + $0xb0] ss:$8 sps:$4 sm:$0xff]  }
  0x31   :  { %v5667_v62 = vld [vmem:[%s6679_s3 + $0xb4] ss:$8 sps:$4 sm:$0xff]   ;;  %v5579_v1 = vld [vmem:[%s6676_s0 + $0x50] ss:$8 sps:$4 sm:$0xff]   ;;  %v5580_v2 = vld [vmem:[%s6676_s0 + $0x64] ss:$8 sps:$4 sm:$0xff]  }
  0x32   :  { %401 = vmatpush1.bf16.msra.mxu0 %v5555_v7  ;;  %908 = vmatpush1.bf16.msra.mxu1 %v5630_v28  ;;  %v5582_v3 = vld [vmem:[%s6676_s0 + $0x60] ss:$8 sps:$4 sm:$0xff]   ;;  %v5583_v4 = vld [vmem:[%s6676_s0 + $0x74] ss:$8 sps:$4 sm:$0xff]   ;;  %v5585_v5 = vld [vmem:[%s6676_s0 + $0x70] ss:$8 sps:$4 sm:$0xff]  }
  0x33   :  { %402 = vmatprep.subr.bf16.mxu0 %v6016_v0  ;;  %909 = vmatprep.subr.bf16.mxu1 %v5631_v30  ;;  %v5589_v6 = vld [vmem:[%s6676_s0 + $0x84] ss:$8 sps:$4 sm:$0xff]   ;;  %v5591_v7 = vld [vmem:[%s6676_s0 + $0x80] ss:$8 sps:$4 sm:$0xff]   ;;  %v5676_v12 = vld [vmem:[%s6679_s3 + $0x94] ss:$8 sps:$4 sm:$0xff]  }
  0x34   :  { %v5601_v13 = vld [vmem:[%s6676_s0 + $0xa4] ss:$8 sps:$4 sm:$0xff]   ;;  %v5673_v14 = vld [vmem:[%s6679_s3 + $0x100] ss:$8 sps:$4 sm:$0xff]   ;;  %v5607_v20 = vld [vmem:[%s6676_s0 + $0xb4] ss:$8 sps:$4 sm:$0xff]  }
  0x35   :  { %v5675_v15 = vld [vmem:[%s6679_s3 + $0x104] ss:$8 sps:$4 sm:$0xff]   ;;  %v5681_v18 = vld [vmem:[%s6679_s3 + $0x80] ss:$8 sps:$4 sm:$0xff]   ;;  %v5655_v28 = vld [vmem:[%s6676_s0 + $0xf4] ss:$8 sps:$4 sm:$0xff]  }
  0x36   :  { %403 = vmatpush1.bf16.msra.mxu0 %v5556_v8  ;;  %910 = vmatpush1.bf16.msra.mxu1 %v5633_v34  ;;  %v5595_v8 = vld [vmem:[%s6676_s0 + $0x94] ss:$8 sps:$4 sm:$0xff]   ;;  %v5679_v17 = vld [vmem:[%s6679_s3 + $0x84] ss:$8 sps:$4 sm:$0xff]   ;;  %v5627_v23 = vld [vmem:[%s6676_s0 + $0xc0] ss:$8 sps:$4 sm:$0xff]  }
  0x37   :  { %404 = vmatprep.subr.bf16.mxu0 %v6016_v0  ;;  %911 = vmatprep.subr.bf16.mxu1 %v5640_v37  ;;  %v5648_v27 = vld [vmem:[%s6676_s0 + $0xe0] ss:$8 sps:$4 sm:$0xff]   ;;  %v5682_v30 = vld [vmem:[#allocation6 + $0xf8] sm:$0xff]  }
  0x3a   :  { %405 = vmatpush1.bf16.msra.mxu0 %v5557_v9  ;;  %912 = vmatpush1.bf16.msra.mxu1 %v5642_v38  ;;  %v5670_v9 = vld [vmem:[%s6679_s3 + $0xa4] ss:$8 sps:$4 sm:$0xff]  }
  0x3b   :  { %414 = vmatprep.subr.bf16.mxu0 %v6016_v0  ;;  %913 = vmatprep.subr.bf16.mxu1 %v5643_v40 }
  0x3e   :  { %415 = vmatpush2.bf16.msra.mxu0 %v5558_v10  ;;  %914 = vmatpush1.bf16.msra.mxu1 %v5645_v45  ;;  %v5672_v10 = vld [vmem:[%s6679_s3 + $0xa0] ss:$8 sps:$4 sm:$0xff]  }
  0x3f   :  { %416 = vmatprep.subr.bf16.mxu0 %v6016_v0  ;;  %915 = vmatprep.subr.bf16.mxu1 %v5649_v47 }
  0x42   :  { %417 = vmatpush2.bf16.msra.mxu0 %v5559_v11  ;;  %916 = vmatpush2.bf16.msra.mxu1 %v5651_v48  ;;  %v5597_v11 = vld [vmem:[%s6676_s0 + $0x90] ss:$8 sps:$4 sm:$0xff]  }
  0x43   :  { %418 = vmatprep.subr.bf16.mxu0 %v6016_v0  ;;  %917 = vmatprep.subr.bf16.mxu1 %v5652_v50  ;;  %v5685_v48 = vld [vmem:[#allocation6 + $0xb0] sm:$0xff]   ;;  %v5686_v50 = vld [vmem:[#allocation6 + $0xe8] sm:$0xff]  }
  0x46   :  { %419 = vmatpush2.bf16.msra.mxu0 %v5560_v16  ;;  %918 = vmatpush2.bf16.msra.mxu1 %v5654_v53  ;;  %v5678_v16 = vld [vmem:[%s6679_s3 + $0x90] ss:$8 sps:$4 sm:$0xff]  }
  0x47   :  { %420 = vmatprep.subr.bf16.mxu0 %v6016_v0  ;;  %919 = vmatprep.subr.bf16.mxu1 %v5661_v56 }
  0x4a   :  { %421 = vmatpush2.bf16.msra.mxu0 %v5561_v19  ;;  %920 = vmatpush2.bf16.msra.mxu1 %v5663_v57  ;;  %v5603_v19 = vld [vmem:[%s6676_s0 + $0xa0] ss:$8 sps:$4 sm:$0xff]  }
  0x4b   :  { %1092 = vmatprep.subr.bf16.mxu0 %v5588_v21  ;;  %921 = vmatprep.subr.bf16.mxu1 %v5664_v58  ;;  %v5609_v21 = vld [vmem:[%s6676_s0 + $0xb0] ss:$8 sps:$4 sm:$0xff]   ;;  %v5688_v57 = vld [vmem:[#allocation6 + $0xe0] sm:$0xff]  }
  0x4d   :  { %423 = vmatmul.mubr.bf16.vlgmr.msra.gmra.mxu0 %v5562_v22  ;;  %v5625_v22 = vld [vmem:[%s6676_s0 + $0xc4] ss:$8 sps:$4 sm:$0xff]  }
  0x4e   :  { %4702 = vmatprep.mubr.msk.bf16.mxu0 %vm341_vm0, %v5565_v24  ;;  %1093 = vmatpush1.bf16.msra.mxu0 %v5586_v25  ;;  %v5634_v24 = vld [vmem:[%s6676_s0 + $0xd4] ss:$8 sps:$4 sm:$0xff]   ;;  %v5639_v25 = vld [vmem:[%s6676_s0 + $0xd0] ss:$8 sps:$4 sm:$0xff]  }
  0x4f   :  { %1094 = vmatprep.subr.bf16.mxu0 %v5594_v26  ;;  %922 = vmatpush2.bf16.msra.mxu1 %v5666_v60  ;;  %v5646_v26 = vld [vmem:[%s6676_s0 + $0xe4] ss:$8 sps:$4 sm:$0xff]  }
  0x50   :  { %923 = vmatprep.subr.bf16.mxu1 %v5667_v62 }
  0x52   :  { %1095 = vmatpush1.bf16.msra.mxu0 %v5592_v29  ;;  %v5660_v29 = vld [vmem:[%s6676_s0 + $0xf0] ss:$8 sps:$4 sm:$0xff]  }
  0x53   :  { %1096 = vmatprep.subr.bf16.mxu0 %v5600_v32  ;;  %924 = vmatpush2.bf16.msra.mxu1 %v5669_v63  ;;  %v5690_v63 = vld [vmem:[#allocation6 + $0xd8] sm:$0xff]  }
  0x54   :  { %925 = vmatprep.subr.bf16.mxu1 %v5670_v9 }
  0x55   :  { %431 = vmatmul.mubr.bf16.gmra.mxu0 %v5567_v31  ;;  %v6350_v31 = vld [vmem:[%s6678_s2] ss:$0 sm:$0xff] }
  0x56   :  { %4703 = vmatprep.mubr.msk.bf16.mxu0 %vm341_vm0, %v5568_v33  ;;  %1097 = vmatpush1.bf16.msra.mxu0 %v5598_v35 }
  0x57   :  { %1098 = vmatprep.subr.bf16.mxu0 %v5606_v36  ;;  %926 = vmatpush2.bf16.msra.mxu1 %v5672_v10 }
  0x58   :  { %927 = vmatprep.subr.bf16.mxu1 %v5676_v12  ;;  %v5693_v12 = vld [vmem:[#allocation6 + $0x90] sm:$0xff]  }
  0x5a   :  { %1099 = vmatpush1.bf16.msra.mxu0 %v5604_v39 }
  0x5b   :  { %1100 = vmatprep.subr.bf16.mxu0 %v5618_v42  ;;  %928 = vmatpush2.bf16.msra.mxu1 %v5678_v16  ;;  %v5683_v42 = vld [vmem:[#allocation6 + $0xb8] sm:$0xff]  }
  0x5c   :  { %929 = vmatprep.subr.bf16.mxu1 %v5679_v17 }
  0x5d   :  { %439 = vmatmul.mubr.bf16.gmra.mxu0 %v5570_v41 }
  0x5e   :  { %4704 = vmatprep.mubr.msk.bf16.mxu0 %vm341_vm0, %v5571_v43  ;;  %1101 = vmatpush1.bf16.msra.mxu0 %v5616_v44  ;;  %v5684_v44 = vld [vmem:[#allocation6 + $0xf0] sm:$0xff]  }
  0x5f   :  { %1102 = vmatprep.subr.bf16.mxu0 %v5638_v46  ;;  %930 = vmatpush2.bf16.msra.mxu1 %v5681_v18 }
  0x60   :  { %5159 = vmatprep.subr.bf16.mxu1 %v5682_v30 }
  0x62   :  { %1103 = vmatpush1.bf16.msra.mxu0 %v5636_v49 }
  0x63   :  { %1104 = vmatprep.subr.bf16.mxu0 %v5659_v51 }
  0x65   :  { %447 = vmatmul.mubr.bf16.gmra.mxu0 %v5573_v52 }
  0x66   :  { %4705 = vmatprep.mubr.msk.bf16.mxu0 %vm341_vm0, %v5574_v54  ;;  %1105 = vmatpush1.bf16.msra.mxu0 %v5657_v55  ;;  %v5687_v55 = vld [vmem:[#allocation6 + $0xa8] sm:$0xff]  }
  0x67   :  { %1106 = vmatprep.subr.bf16.mxu0 %v5675_v15 }
  0x6a   :  { %1107 = vmatpush1.bf16.msra.mxu0 %v5673_v14  ;;  %v5694_v14 = vld [vmem:[#allocation6 + $0xc8] sm:$0xff]  }
  0x6d   :  { %455 = vmatmul.mubr.bf16.gmra.mxu0 %v5576_v59 }
  0x6e   :  { %4706 = vmatprep.mubr.msk.bf16.mxu0 %vm341_vm0, %v5577_v61  ;;  %v5689_v61 = vld [vmem:[#allocation6 + $0xa0] sm:$0xff]  }
  0x75   :  { %463 = vmatmul.mubr.bf16.gmra.mxu0 %v5579_v1 }
  0x76   :  { %4707 = vmatprep.mubr.msk.bf16.mxu0 %vm341_vm0, %v5580_v2 }
  0x7d   :  { %471 = vmatmul.mubr.bf16.gmra.mxu0 %v5582_v3 }
  0x7e   :  { %4708 = vmatprep.mubr.msk.bf16.mxu0 %vm341_vm0, %v5583_v4 }
  0x85   :  { %479 = vmatmul.mubr.bf16.gmra.mxu0 %v5585_v5 }
  0x86   :  { %4709 = vmatprep.mubr.msk.bf16.mxu0 %vm341_vm0, %v5589_v6  ;;  %v5691_v6 = vld [vmem:[#allocation6 + $0x98] sm:$0xff]  }
  0x8d   :  { %487 = vmatmul.mubr.bf16.gmra.mxu0 %v5591_v7 }
  0x8e   :  { %4710 = vmatprep.mubr.msk.bf16.mxu0 %vm341_vm0, %v5595_v8  ;;  %v5692_v8 = vld [vmem:[#allocation6 + $0xd0] sm:$0xff]  }
  0x95   :  { %495 = vmatmul.mubr.bf16.gmra.mxu0 %v5597_v11 }
  0x96   :  { %4711 = vmatprep.mubr.msk.bf16.mxu0 %vm341_vm0, %v5601_v13 }
  0x9d   :  { %503 = vmatmul.mubr.bf16.gmra.mxu0 %v5603_v19  ;;  %v5695_v19 = vld [vmem:[#allocation6 + $0x88] sm:$0xff]  }
  0x9e   :  { %4712 = vmatprep.mubr.msk.bf16.mxu0 %vm341_vm0, %v5607_v20 }
  0xa5   :  { %511 = vmatmul.mubr.bf16.gmra.mxu0 %v5609_v21 }
  0xa6   :  { %4713 = vmatprep.mubr.msk.bf16.mxu0 %vm341_vm0, %v5625_v22 }
  0xad   :  { %519 = vmatmul.mubr.bf16.gmra.mxu0 %v5627_v23 }
  0xae   :  { %4714 = vmatprep.mubr.msk.bf16.mxu0 %vm341_vm0, %v5634_v24 }
  0xb5   :  { %527 = vmatmul.mubr.bf16.gmra.mxu0 %v5639_v25 }
  0xb6   :  { %4715 = vmatprep.mubr.msk.bf16.mxu0 %vm341_vm0, %v5646_v26 }
  0xbd   :  { %535 = vmatmul.mubr.bf16.gmra.mxu0 %v5648_v27 }
  0xbe   :  { %4716 = vmatprep.mubr.msk.bf16.mxu0 %vm341_vm0, %v5655_v28 }
  0xc5   :  { %543 = vmatmul.mubr.bf16.gmra.mxu0 %v5660_v29 }
  0xc6   :  { %1124 = vmatprep.mubr.bf16.mxu0 %v6016_v0 }
 0x10d   :  { %v424_v32 = vpop.f32.mrf.mxu0 }
 0x10e   :  { %v425_v34 = vadd.f32 %v6350_v31, %v424_v32 }
 0x10f   :  { %v426_v33 = vpop.f32.mrf.mxu0 }
 0x110   :  { %v551_v38 = vmax.f32 %v425_v34, 0.0 }
 0x111   :  { %v427_v35 = vpop.f32.mrf.mxu0 }
 0x112   :  { %v428_v36 = vadd.f32 %v6350_v31, %v427_v35 }
 0x113   :  { %v429_v37 = vpop.f32.mrf.mxu0 }
 0x114   :  { %v552_v39 = vmax.f32 %v428_v36, 0.0 }
 0x115   :  { %v432_v40 = vpop.f32.mrf.mxu0 }
 0x116   :  { %v583_v41 = vpack.c.bf16 %v552_v39, %v551_v38  ;;  %v433_v45 = vadd.f32 %v6350_v31, %v432_v40 }
 0x117   :  { %v434_v43 = vpop.f32.mrf.mxu0 }
 0x118   :  { %931 = vmatprep.mubr.bf16.mxu1 %v583_v41  ;;  %v553_v51 = vmax.f32 %v433_v45, 0.0 }
 0x119   :  { %v435_v46 = vpop.f32.mrf.mxu0  ;;  %932 = vmatmul.mubr.bf16.vlgmr.msra.gmra.mxu1 %v6016_v0 }
 0x11a   :  { %v436_v47 = vadd.f32 %v6350_v31, %v435_v46  ;;  %5160 = vmatpush3.bf16.msra.mxu1 %v5683_v42 }
 0x11b   :  { %v437_v49 = vpop.f32.mrf.mxu0  ;;  %5161 = vmatprep.subr.bf16.mxu1 %v5684_v44 }
 0x11c   :  { %v554_v52 = vmax.f32 %v436_v47, 0.0 }
 0x11d   :  { %v440_v53 = vpop.f32.mrf.mxu0 }
 0x11e   :  { %v584_v54 = vpack.c.bf16 %v554_v52, %v553_v51  ;;  %5162 = vmatpush3.bf16.msra.mxu1 %v5685_v48  ;;  %v441_v58 = vadd.f32 %v6350_v31, %v440_v53 }
 0x11f   :  { %v442_v56 = vpop.f32.mrf.mxu0  ;;  %5163 = vmatprep.subr.bf16.mxu1 %v5686_v50 }
 0x120   :  { %941 = vmatprep.mubr.bf16.mxu1 %v584_v54  ;;  %1125 = vmatmul.mubr.bf16.vlgmr.msra.gmra.mxu0 %v584_v54  ;;  %v555_v1 = vmax.f32 %v441_v58, 0.0 }
 0x121   :  { %v443_v59 = vpop.f32.mrf.mxu0  ;;  %942 = vmatmul.mubr.bf16.gmra.mxu1 %v583_v41  ;;  %1134 = vmatprep.mubr.bf16.mxu0 %v6016_v0 }
 0x122   :  { %v444_v60 = vadd.f32 %v6350_v31, %v443_v59  ;;  %5164 = vmatpush3.bf16.msra.mxu1 %v5687_v55 }
 0x123   :  { %v445_v62 = vpop.f32.mrf.mxu0  ;;  %5165 = vmatprep.subr.bf16.mxu1 %v5688_v57 }
 0x124   :  { %v556_v2 = vmax.f32 %v444_v60, 0.0 }
 0x125   :  { %v448_v3 = vpop.f32.mrf.mxu0 }
 0x126   :  { %v585_v4 = vpack.c.bf16 %v556_v2, %v555_v1  ;;  %v449_v5 = vadd.f32 %v6350_v31, %v448_v3  ;;  %5166 = vmatpush3.bf16.msra.mxu1 %v5689_v61 }
 0x127   :  { %v450_v7 = vpop.f32.mrf.mxu0  ;;  %5167 = vmatprep.subr.bf16.mxu1 %v5690_v63 }
 0x128   :  { %951 = vmatprep.mubr.bf16.mxu1 %v585_v4  ;;  %1135 = vmatmul.mubr.bf16.gmra.mxu0 %v585_v4  ;;  %v557_v10 = vmax.f32 %v449_v5, 0.0 }
 0x129   :  { %v451_v9 = vpop.f32.mrf.mxu0  ;;  %952 = vmatmul.mubr.bf16.gmra.mxu1 %v584_v54  ;;  %1144 = vmatprep.mubr.bf16.mxu0 %v6016_v0 }
 0x12a   :  { %v452_v11 = vadd.f32 %v6350_v31, %v451_v9  ;;  %5168 = vmatpush3.bf16.msra.mxu1 %v5691_v6 }
 0x12b   :  { %v453_v13 = vpop.f32.mrf.mxu0  ;;  %5169 = vmatprep.subr.bf16.mxu1 %v5692_v8 }
 0x12c   :  { %v558_v15 = vmax.f32 %v452_v11, 0.0 }
 0x12d   :  { %v456_v16 = vpop.f32.mrf.mxu0 }
 0x12e   :  { %v586_v17 = vpack.c.bf16 %v558_v15, %v557_v10  ;;  %v457_v18 = vadd.f32 %v6350_v31, %v456_v16  ;;  %5170 = vmatpush3.bf16.msra.mxu1 %v5693_v12 }
 0x12f   :  { %v458_v20 = vpop.f32.mrf.mxu0  ;;  %5171 = vmatprep.subr.bf16.mxu1 %v5694_v14 }
 0x130   :  { %961 = vmatprep.mubr.bf16.mxu1 %v586_v17  ;;  %1145 = vmatmul.mubr.bf16.gmra.mxu0 %v586_v17  ;;  %v559_v22 = vmax.f32 %v457_v18, 0.0 }
 0x131   :  { %v459_v21 = vpop.f32.mrf.mxu0  ;;  %962 = vmatmul.mubr.bf16.gmra.mxu1 %v585_v4  ;;  %1154 = vmatprep.mubr.bf16.mxu0 %v6016_v0 }
 0x132   :  { %v460_v23 = vadd.f32 %v6350_v31, %v459_v21  ;;  %5172 = vmatpush3.bf16.msra.mxu1 %v5695_v19 }
 0x133   :  { %v461_v24 = vpop.f32.mrf.mxu0 }
 0x134   :  { %v560_v25 = vmax.f32 %v460_v23, 0.0  ;;  %v5696_v23 = vld [vmem:[#allocation6 + $0xc0] sm:$0xff]  }
 0x135   :  { %v464_v26 = vpop.f32.mrf.mxu0  ;;  %5173 = vmatprep.subr.bf16.mxu1 %v5696_v23  ;;  %v649_v23 = vlaneseq }
 0x136   :  { %v587_v27 = vpack.c.bf16 %v560_v25, %v559_v22  ;;  %v465_v28 = vadd.f32 %v6350_v31, %v464_v26 }
 0x137   :  { %v466_v29 = vpop.f32.mrf.mxu0 }
 0x138   :  { %1155 = vmatmul.mubr.bf16.gmra.mxu0 %v587_v27  ;;  %971 = vmatprep.mubr.bf16.mxu1 %v587_v27  ;;  %v561_v32 = vmax.f32 %v465_v28, 0.0  ;;  %v5698_v28 = vld [vmem:[#allocation6 + $0x278] sm:$0xff]  }
 0x139   :  { %v467_v30 = vpop.f32.mrf.mxu0  ;;  %972 = vmatmul.mubr.bf16.gmra.mxu1 %v586_v17  ;;  %1164 = vmatprep.mubr.bf16.mxu0 %v6016_v0 }
 0x13a   :  { %v468_v33 = vadd.f32 %v6350_v31, %v467_v30  ;;  %v5699_v30 = vld [vmem:[#allocation6 + $0x238] sm:$0xff]   ;;  %5247 = vmatprep.subr.bf16.mxu0 %v5698_v28 }
 0x13b   :  { %v469_v34 = vpop.f32.mrf.mxu0  ;;  %5248 = vmatpush3.bf16.msra.mxu0 %v5699_v30 }
 0x13c   :  { %v562_v35 = vmax.f32 %v468_v33, 0.0 }
 0x13d   :  { %v472_v36 = vpop.f32.mrf.mxu0 }
 0x13e   :  { %v588_v37 = vpack.c.bf16 %v562_v35, %v561_v32  ;;  %v473_v38 = vadd.f32 %v6350_v31, %v472_v36  ;;  %v5700_v36 = vld [vmem:[#allocation6 + $0x270] sm:$0xff]  }
 0x13f   :  { %v474_v39 = vpop.f32.mrf.mxu0  ;;  %5249 = vmatprep.subr.bf16.mxu0 %v5700_v36 }
 0x140   :  { %1165 = vmatmul.mubr.bf16.gmra.mxu0 %v588_v37  ;;  %981 = vmatprep.mubr.bf16.mxu1 %v588_v37  ;;  %v563_v41 = vmax.f32 %v473_v38, 0.0 }
 0x141   :  { %v475_v40 = vpop.f32.mrf.mxu0  ;;  %982 = vmatmul.mubr.bf16.gmra.mxu1 %v587_v27  ;;  %1174 = vmatprep.mubr.bf16.mxu0 %v6016_v0  ;;  %v5697_v27 = vld [vmem:[#allocation6 + $0x80] sm:$0xff]  }
 0x142   :  { %v476_v42 = vadd.f32 %v6350_v31, %v475_v40  ;;  %5174 = vmatpush3.bf16.msra.mxu1 %v5697_v27 }
 0x143   :  { %v477_v43 = vpop.f32.mrf.mxu0 }
 0x144   :  { %v564_v44 = vmax.f32 %v476_v42, 0.0  ;;  %v5702_v42 = vld [vmem:[#allocation6 + $0x78] sm:$0xff]   ;;  %v5703_v43 = vld [vmem:[#allocation6 + $0x268] sm:$0xff]  }
 0x145   :  { %v480_v45 = vpop.f32.mrf.mxu0  ;;  %5181 = vmatprep.subr.bf16.mxu1 %v5702_v42 }
 0x146   :  { %v589_v46 = vpack.c.bf16 %v564_v44, %v563_v41  ;;  %v481_v47 = vadd.f32 %v6350_v31, %v480_v45 }
 0x147   :  { %v482_v48 = vpop.f32.mrf.mxu0 }
 0x148   :  { %1175 = vmatmul.mubr.bf16.gmra.mxu0 %v589_v46  ;;  %991 = vmatprep.mubr.bf16.mxu1 %v589_v46  ;;  %v565_v50 = vmax.f32 %v481_v47, 0.0 }
 0x149   :  { %v483_v49 = vpop.f32.mrf.mxu0  ;;  %992 = vmatmul.mubr.bf16.gmra.mxu1 %v588_v37  ;;  %1184 = vmatprep.mubr.bf16.mxu0 %v6016_v0  ;;  %v5701_v37 = vld [vmem:[#allocation6 + $0x230] sm:$0xff]  }
 0x14a   :  { %v484_v51 = vadd.f32 %v6350_v31, %v483_v49  ;;  %5250 = vmatpush3.bf16.msra.mxu0 %v5701_v37 }
 0x14b   :  { %v485_v52 = vpop.f32.mrf.mxu0  ;;  %5251 = vmatprep.subr.bf16.mxu0 %v5703_v43 }
 0x14c   :  { %v566_v53 = vmax.f32 %v484_v51, 0.0  ;;  %v5709_v52 = vld [vmem:[#allocation6 + $0x220] sm:$0xff]  }
 0x14d   :  { %v488_v54 = vpop.f32.mrf.mxu0 }
 0x14e   :  { %v590_v55 = vpack.c.bf16 %v566_v53, %v565_v50  ;;  %v489_v56 = vadd.f32 %v6350_v31, %v488_v54  ;;  %v5707_v50 = vld [vmem:[#allocation6 + $0x260] sm:$0xff]  }
 0x14f   :  { %v490_v57 = vpop.f32.mrf.mxu0 }
 0x150   :  { %1185 = vmatmul.mubr.bf16.gmra.mxu0 %v590_v55  ;;  %1001 = vmatprep.mubr.bf16.mxu1 %v590_v55  ;;  %v567_v59 = vmax.f32 %v489_v56, 0.0  ;;  %v5711_v57 = vld [vmem:[#allocation6 + $0x258] sm:$0xff]  }
 0x151   :  { %v491_v58 = vpop.f32.mrf.mxu0  ;;  %1002 = vmatmul.mubr.bf16.gmra.mxu1 %v589_v46  ;;  %1194 = vmatprep.mubr.bf16.mxu0 %v6016_v0  ;;  %v5705_v46 = vld [vmem:[#allocation6 + $0x228] sm:$0xff]  }
 0x152   :  { %v492_v60 = vadd.f32 %v6350_v31, %v491_v58  ;;  %5252 = vmatpush3.bf16.msra.mxu0 %v5705_v46 }
 0x153   :  { %v493_v61 = vpop.f32.mrf.mxu0  ;;  %5253 = vmatprep.subr.bf16.mxu0 %v5707_v50 }
 0x154   :  { %v568_v62 = vmax.f32 %v492_v60, 0.0 }
 0x155   :  { %v496_v63 = vpop.f32.mrf.mxu0 }
 0x156   :  { %v591_v1 = vpack.c.bf16 %v568_v62, %v567_v59  ;;  %v497_v2 = vadd.f32 %v6350_v31, %v496_v63  ;;  %5254 = vmatpush3.bf16.msra.mxu0 %v5709_v52  ;;  %v5713_v59 = vld [vmem:[#allocation6 + $0x218] sm:$0xff]   ;;  %v5715_v63 = vld [vmem:[#allocation6 + $0x250] sm:$0xff]  }
 0x157   :  { %v498_v3 = vpop.f32.mrf.mxu0  ;;  %5255 = vmatprep.subr.bf16.mxu0 %v5711_v57 }
 0x158   :  { %1195 = vmatmul.mubr.bf16.gmra.mxu0 %v591_v1  ;;  %1011 = vmatprep.mubr.bf16.mxu1 %v591_v1  ;;  %v569_v5 = vmax.f32 %v497_v2, 0.0  ;;  %v5717_v2 = vld [vmem:[#allocation6 + $0x210] sm:$0xff]  }
 0x159   :  { %v499_v4 = vpop.f32.mrf.mxu0  ;;  %1012 = vmatmul.mubr.bf16.gmra.mxu1 %v590_v55  ;;  %1204 = vmatprep.mubr.bf16.mxu0 %v6016_v0 }
 0x15a   :  { %v500_v6 = vadd.f32 %v6350_v31, %v499_v4  ;;  %5256 = vmatpush3.bf16.msra.mxu0 %v5713_v59 }
 0x15b   :  { %v501_v7 = vpop.f32.mrf.mxu0  ;;  %5257 = vmatprep.subr.bf16.mxu0 %v5715_v63 }
 0x15c   :  { %v570_v8 = vmax.f32 %v500_v6, 0.0  ;;  %v5719_v7 = vld [vmem:[#allocation6 + $0x248] sm:$0xff]  }
 0x15d   :  { %v504_v9 = vpop.f32.mrf.mxu0 }
 0x15e   :  { %v592_v10 = vpack.c.bf16 %v570_v8, %v569_v5  ;;  %v505_v11 = vadd.f32 %v6350_v31, %v504_v9  ;;  %5258 = vmatpush3.bf16.msra.mxu0 %v5717_v2  ;;  %v5721_v9 = vld [vmem:[#allocation6 + $0x208] sm:$0xff]  }
 0x15f   :  { %v506_v12 = vpop.f32.mrf.mxu0  ;;  %5259 = vmatprep.subr.bf16.mxu0 %v5719_v7 }
 0x160   :  { %1205 = vmatmul.mubr.bf16.gmra.mxu0 %v592_v10  ;;  %1021 = vmatprep.mubr.bf16.mxu1 %v592_v10  ;;  %v571_v14 = vmax.f32 %v505_v11, 0.0 }
 0x161   :  { %v507_v13 = vpop.f32.mrf.mxu0  ;;  %1022 = vmatmul.mubr.bf16.gmra.mxu1 %v591_v1  ;;  %1214 = vmatprep.mubr.bf16.mxu0 %v6016_v0 }
 0x162   :  { %v508_v15 = vadd.f32 %v6350_v31, %v507_v13  ;;  %5260 = vmatpush3.bf16.msra.mxu0 %v5721_v9  ;;  %v5723_v13 = vld [vmem:[#allocation6 + $0x240] sm:$0xff]  }
 0x163   :  { %v509_v16 = vpop.f32.mrf.mxu0  ;;  %5261 = vmatprep.subr.bf16.mxu0 %v5723_v13 }
 0x164   :  { %v572_v17 = vmax.f32 %v508_v15, 0.0  ;;  %v5725_v15 = vld [vmem:[#allocation6 + $0x200] sm:$0xff]  }
 0x165   :  { %v512_v18 = vpop.f32.mrf.mxu0 }
 0x166   :  { %v593_v19 = vpack.c.bf16 %v572_v17, %v571_v14  ;;  %v513_v20 = vadd.f32 %v6350_v31, %v512_v18  ;;  %5262 = vmatpush3.bf16.msra.mxu0 %v5725_v15 }
 0x167   :  { %v514_v21 = vpop.f32.mrf.mxu0 }
 0x168   :  { %1215 = vmatmul.mubr.bf16.gmra.mxu0 %v593_v19  ;;  %1031 = vmatprep.mubr.bf16.mxu1 %v593_v19  ;;  %v573_v24 = vmax.f32 %v513_v20, 0.0  ;;  %v5727_v20 = vld [vmem:[#allocation6 + $0x378] sm:$0xff]  }
 0x169   :  { %v515_v22 = vpop.f32.mrf.mxu0  ;;  %1032 = vmatmul.mubr.bf16.gmra.mxu1 %v592_v10  ;;  %1224 = vmatprep.mubr.bf16.mxu0 %v6016_v0 }
 0x16a   :  { %v516_v25 = vadd.f32 %v6350_v31, %v515_v22  ;;  %5291 = vmatprep.subr.bf16.mxu0 %v5727_v20 }
 0x16b   :  { %v517_v26 = vpop.f32.mrf.mxu0 }
 0x16c   :  { %v574_v29 = vmax.f32 %v516_v25, 0.0 }
 0x16d   :  { %v520_v32 = vpop.f32.mrf.mxu0 }
 0x16e   :  { %v594_v33 = vpack.c.bf16 %v574_v29, %v573_v24  ;;  %v521_v34 = vadd.f32 %v6350_v31, %v520_v32 }
 0x16f   :  { %v522_v35 = vpop.f32.mrf.mxu0 }
 0x170   :  { %1225 = vmatmul.mubr.bf16.gmra.mxu0 %v594_v33  ;;  %1041 = vmatprep.mubr.bf16.mxu1 %v594_v33  ;;  %v575_v39 = vmax.f32 %v521_v34, 0.0 }
 0x171   :  { %v523_v38 = vpop.f32.mrf.mxu0  ;;  %1042 = vmatmul.mubr.bf16.gmra.mxu1 %v593_v19  ;;  %1234 = vmatprep.mubr.bf16.mxu0 %v6016_v0 }
 0x172   :  { %v524_v40 = vadd.f32 %v6350_v31, %v523_v38 }
 0x173   :  { %v525_v41 = vpop.f32.mrf.mxu0 }
 0x174   :  { %v576_v44 = vmax.f32 %v524_v40, 0.0 }
 0x175   :  { %v528_v45 = vpop.f32.mrf.mxu0 }
 0x176   :  { %v595_v47 = vpack.c.bf16 %v576_v44, %v575_v39  ;;  %v529_v48 = vadd.f32 %v6350_v31, %v528_v45 }
 0x177   :  { %v530_v49 = vpop.f32.mrf.mxu0 }
 0x178   :  { %1235 = vmatmul.mubr.bf16.gmra.mxu0 %v595_v47  ;;  %1051 = vmatprep.mubr.bf16.mxu1 %v595_v47  ;;  %v577_v53 = vmax.f32 %v529_v48, 0.0 }
 0x179   :  { %v531_v51 = vpop.f32.mrf.mxu0  ;;  %1052 = vmatmul.mubr.bf16.gmra.mxu1 %v594_v33  ;;  %1244 = vmatprep.mubr.bf16.mxu0 %v6016_v0  ;;  %v647_v33 = vld [vmem:[%s6680_s4] sm:$0x3] }
 0x17a   :  { %v532_v54 = vadd.f32 %v6350_v31, %v531_v51 }
 0x17b   :  { %v533_v55 = vpop.f32.mrf.mxu0 }
 0x17c   :  { %v578_v56 = vmax.f32 %v532_v54, 0.0 }
 0x17d   :  { %v536_v58 = vpop.f32.mrf.mxu0 }
 0x17e   :  { %v596_v60 = vpack.c.bf16 %v578_v56, %v577_v53  ;;  %v537_v61 = vadd.f32 %v6350_v31, %v536_v58 }
 0x17f   :  { %v538_v62 = vpop.f32.mrf.mxu0 }
 0x180   :  { %1245 = vmatmul.mubr.bf16.gmra.mxu0 %v596_v60  ;;  %1061 = vmatprep.mubr.bf16.mxu1 %v596_v60  ;;  %v579_v3 = vmax.f32 %v537_v61, 0.0 }
 0x181   :  { %v539_v1 = vpop.f32.mrf.mxu0  ;;  %1062 = vmatmul.mubr.bf16.gmra.mxu1 %v595_v47  ;;  %1254 = vmatprep.mubr.bf16.mxu0 %v6016_v0 }
 0x182   :  { %v540_v4 = vadd.f32 %v6350_v31, %v539_v1 }
 0x183   :  { %v541_v5 = vpop.f32.mrf.mxu0 }
 0x184   :  { %v580_v6 = vmax.f32 %v540_v4, 0.0 }
 0x185   :  { %v544_v8 = vpop.f32.mrf.mxu0 }
 0x186   :  { %v597_v10 = vpack.c.bf16 %v580_v6, %v579_v3  ;;  %v545_v11 = vadd.f32 %v6350_v31, %v544_v8  ;;  %v5704_v8 = vld [vmem:[#allocation6 + $0x38] sm:$0xff]  }
 0x187   :  { %v546_v12 = vpop.f32.mrf.mxu0 }
 0x188   :  { %1255 = vmatmul.mubr.bf16.gmra.mxu0 %v597_v10  ;;  %1071 = vmatprep.mubr.bf16.mxu1 %v597_v10  ;;  %v581_v16 = vmax.f32 %v545_v11, 0.0  ;;  %v5706_v11 = vld [vmem:[#allocation6 + $0x70] sm:$0xff]  }
 0x189   :  { %v547_v14 = vpop.f32.mrf.mxu0  ;;  %1072 = vmatmul.mubr.bf16.gmra.mxu1 %v596_v60  ;;  %1264 = vmatprep.mubr.bf16.mxu0 %v6016_v0 }
 0x18a   :  { %v548_v17 = vadd.f32 %v6350_v31, %v547_v14  ;;  %v650_v31 = vshrl.u32 %v649_v23, 7 }
 0x18b   :  { %v549_v18 = vpop.f32.mrf.mxu0 }
 0x18c   :  { %v582_v19 = vmax.f32 %v548_v17, 0.0  ;;  %v655_v30 = vsub.s32 1, %v650_v31  ;;  %v5708_v17 = vld [vmem:[#allocation6 + $0x30] sm:$0xff]  }
 0x18e   :  { %v598_v21 = vpack.c.bf16 %v582_v19, %v581_v16  ;;  %v6412_v37 = vrot.slane %v647_v33, %v655_v30  ;;  %v5710_v19 = vld [vmem:[#allocation6 + $0x68] sm:$0xff]  }
 0x190   :  { %1265 = vmatmul.mubr.bf16.gmra.mxu0 %v598_v21  ;;  %1081 = vmatprep.mubr.bf16.mxu1 %v598_v21 }
 0x191   :  { %1082 = vmatmul.mubr.bf16.gmra.mxu1 %v597_v10  ;;  %1274 = vmatprep.mubr.bf16.mxu0 %v6016_v0 }
 0x198   :  { %1275 = vmatmul.mubr.bf16.gmra.mxu0 %v6016_v0  ;;  %v651_v0 = vsub.s32 0, %v650_v31  ;;  %v5712_v31 = vld [vmem:[#allocation6 + $0x28] sm:$0xff]  }
 0x19a   :  { %v6414_v40 = vrot.slane %v647_v33, %v651_v0 }
 0x1d9   :  { %v6401_v22 = vpop.f32.mrf.mxu1 }
 0x1db   :  { %v935_v24 = vpop.f32.mrf.mxu1 }
 0x1dc   :  { %v936_v47 = vadd.f32 %v935_v24, %v6412_v37 }
 0x1dd   :  { %v6403_v25 = vpop.f32.mrf.mxu1 }
 0x1df   :  { %v939_v26 = vpop.f32.mrf.mxu1 }
 0x1e0   :  { %v6405_v27 = vpop.f32.mrf.mxu0  ;;  %v940_v43 = vadd.f32 %v939_v26, %v6412_v37 }
 0x1e1   :  { %v943_v28 = vpop.f32.mrf.mxu1 }
 0x1e2   :  { %v1128_v29 = vpop.f32.mrf.mxu0  ;;  %v944_v48 = vadd.f32 %v943_v28, %v6414_v40 }
 0x1e3   :  { %v945_v32 = vpop.f32.mrf.mxu1  ;;  %v1129_v57 = vadd.f32 %v1128_v29, %v936_v47  ;;  %v5714_v29 = vld [vmem:[#allocation6 + $0x60] sm:$0xff]  }
 0x1e4   :  { %v6410_v34 = vpop.f32.mrf.mxu0  ;;  %v946_v44 = vadd.f32 %v945_v32, %v6412_v37 }
 0x1e5   :  { %v947_v35 = vpop.f32.mrf.mxu1  ;;  %v1286_v5 = vmax.f32 %v1129_v57, 0.0  ;;  %v5722_v57 = vld [vmem:[#allocation6 + $0x50] sm:$0xff]  }
 0x1e6   :  { %v1132_v36 = vpop.f32.mrf.mxu0  ;;  %v948_v45 = vadd.f32 %v947_v35, %v6414_v40 }
 0x1e7   :  { %v949_v38 = vpop.f32.mrf.mxu1  ;;  %v1133_v50 = vadd.f32 %v1132_v36, %v940_v43 }
 0x1e8   :  { %v1136_v39 = vpop.f32.mrf.mxu0  ;;  %v950_v51 = vadd.f32 %v949_v38, %v6412_v37 }
 0x1e9   :  { %v6416_v41 = vpop.f32.mrf.mxu1  ;;  %v1137_v55 = vadd.f32 %v1136_v39, %v944_v48  ;;  %v1288_v62 = vmax.f32 %v1133_v50, 0.0  ;;  %v5716_v39 = vld [vmem:[#allocation6 + $0x20] sm:$0xff]  }
 0x1ea   :  { %v1138_v42 = vpop.f32.mrf.mxu0 }
 0x1eb   :  { %v6421_v46 = vpop.f32.mrf.mxu1  ;;  %v1139_v52 = vadd.f32 %v1138_v42, %v946_v44  ;;  %v1289_v3 = vmax.f32 %v1137_v55, 0.0  ;;  %v5130_v12 = vpack.c.bf16 %v1288_v62, %v1286_v5  ;;  %v5718_v44 = vld [vmem:[#allocation6 + $0x58] sm:$0xff]  }
 0x1ec   :  { %v1140_v49 = vpop.f32.mrf.mxu0 }
 0x1ed   :  { %v1141_v53 = vadd.f32 %v1140_v49, %v948_v45  ;;  %v6426_v54 = vpop.f32.mrf.mxu1  ;;  %v1290_v63 = vmax.f32 %v1139_v52, 0.0 }
 0x1ee   :  { %v1142_v56 = vpop.f32.mrf.mxu0 }
 0x1ef   :  { %v1143_v58 = vadd.f32 %v1142_v56, %v950_v51  ;;  %v6428_v59 = vpop.f32.mrf.mxu1  ;;  %v1291_v60 = vmax.f32 %v1141_v53, 0.0  ;;  %v5720_v53 = vld [vmem:[#allocation6 + $0x18] sm:$0xff]  }
 0x1f0   :  { %v6430_v61 = vpop.f32.mrf.mxu0 }
 0x1f1   :  { %v1292_v1 = vmax.f32 %v1143_v58, 0.0  ;;  %v963_v2 = vpop.f32.mrf.mxu1  ;;  %v5127_v9 = vpack.c.bf16 %v1291_v60, %v1289_v3 }
 0x1f2   :  { %v6432_v4 = vpop.f32.mrf.mxu0  ;;  %v964_v15 = vadd.f32 %v963_v2, %v6414_v40 }
 0x1f3   :  { %v5128_v6 = vpack.c.bf16 %v1292_v1, %v1290_v63  ;;  %v6434_v7 = vpop.f32.mrf.mxu1 }
 0x1f4   :  { %v6436_v10 = vpop.f32.mrf.mxu0 }
 0x1f5   :  { %v967_v13 = vpop.f32.mrf.mxu1  ;;  %1780 = vmatprep.mubr.bf16.mxu1 %v5128_v6  ;;  %v5724_v6 = vld [vmem:[#allocation6 + $0x10] sm:$0xff]  }
 0x1f6   :  { %v6438_v14 = vpop.f32.mrf.mxu0  ;;  %1781 = vmatmul.mubr.bf16.vlgmr.msra.gmra.mxu1 %v5127_v9  ;;  %v968_v24 = vadd.f32 %v967_v13, %v6414_v40 }
 0x1f7   :  { %5182 = vmatpush3.bf16.msra.mxu1 %v5704_v8  ;;  %v6441_v16 = vpop.f32.mrf.mxu1  ;;  %1927 = vmatprep.mubr.bf16.mxu1 %v5130_v12 }
 0x1f8   :  { %v1156_v18 = vpop.f32.mrf.mxu0  ;;  %5183 = vmatprep.subr.bf16.mxu1 %v5706_v11  ;;  %v5726_v11 = vld [vmem:[#allocation6 + $0x48] sm:$0xff]  }
 0x1f9   :  { %v1157_v20 = vadd.f32 %v1156_v18, %v964_v15  ;;  %v973_v21 = vpop.f32.mrf.mxu1 }
 0x1fa   :  { %v6443_v23 = vpop.f32.mrf.mxu0  ;;  %v974_v33 = vadd.f32 %v973_v21, %v6414_v40 }
 0x1fb   :  { %5184 = vmatpush3.bf16.msra.mxu1 %v5708_v17  ;;  %v975_v26 = vpop.f32.mrf.mxu1  ;;  %v1297_v35 = vmax.f32 %v1157_v20, 0.0  ;;  %v938_v20 = vadd.f32 %v6403_v25, %v6414_v40  ;;  %v5730_v25 = vld [vmem:[#allocation6 + $0x40] sm:$0xff]  }
 0x1fc   :  { %v1160_v28 = vpop.f32.mrf.mxu0  ;;  %5185 = vmatprep.subr.bf16.mxu1 %v5710_v19  ;;  %v976_v38 = vadd.f32 %v975_v26, %v6412_v37  ;;  %v934_v19 = vadd.f32 %v6401_v22, %v6414_v40  ;;  %v956_v22 = vadd.f32 %v6421_v46, %v6412_v37  ;;  %v5732_v46 = vld [vmem:[#allocation6] sm:$0xff]  }
 0x1fd   :  { %v1161_v30 = vadd.f32 %v1160_v28, %v968_v24  ;;  %v977_v32 = vpop.f32.mrf.mxu1  ;;  %v5728_v28 = vld [vmem:[#allocation6 + $0x8] sm:$0xff]  }
 0x1fe   :  { %v6447_v0 = vpop.f32.mrf.mxu0  ;;  %v978_v47 = vadd.f32 %v977_v32, %v6414_v40 }
 0x1ff   :  { %v1299_v36 = vmax.f32 %v1161_v30, 0.0  ;;  %5186 = vmatpush3.bf16.msra.mxu1 %v5712_v31  ;;  %v979_v42 = vpop.f32.mrf.mxu1  ;;  %v960_v31 = vadd.f32 %v6428_v59, %v6412_v37 }
 0x200   :  { %v1166_v43 = vpop.f32.mrf.mxu0  ;;  %5187 = vmatprep.subr.bf16.mxu1 %v5714_v29  ;;  %v980_v52 = vadd.f32 %v979_v42, %v6412_v37  ;;  %v5729_v29 = vld [vmem:[#allocation6 + $0x338] sm:$0xff]  }
 0x201   :  { %v6450_v45 = vpack.c.bf16 %v1299_v36, %v1297_v35  ;;  %v983_v48 = vpop.f32.mrf.mxu1  ;;  %v1167_v49 = vadd.f32 %v1166_v43, %v974_v33  ;;  %v1131_v35 = vadd.f32 %v6410_v34, %v938_v20  ;;  %v5731_v36 = vld [vmem:[#allocation6 + $0x370] sm:$0xff]  }
 0x202   :  { %v1168_v50 = vpop.f32.mrf.mxu0  ;;  %v984_v60 = vadd.f32 %v983_v48, %v6414_v40  ;;  %v5733_v48 = vld [vmem:[#allocation6 + $0x330] sm:$0xff]  }
 0x203   :  { %v1169_v51 = vadd.f32 %v1168_v50, %v976_v38  ;;  %5188 = vmatpush3.bf16.msra.mxu1 %v5716_v39  ;;  %v985_v55 = vpop.f32.mrf.mxu1  ;;  %v1301_v63 = vmax.f32 %v1167_v49, 0.0  ;;  %v1153_v39 = vadd.f32 %v6438_v14, %v960_v31 }
 0x204   :  { %v1170_v56 = vpop.f32.mrf.mxu0  ;;  %5189 = vmatprep.subr.bf16.mxu1 %v5718_v44  ;;  %v986_v8 = vadd.f32 %v985_v55, %v6412_v37  ;;  %v1127_v44 = vadd.f32 %v6405_v27, %v934_v19  ;;  %v5734_v55 = vld [vmem:[#allocation6 + $0x178] sm:$0xff]  }
 0x205   :  { %v1171_v58 = vadd.f32 %v1170_v56, %v978_v47  ;;  %v987_v62 = vpop.f32.mrf.mxu1  ;;  %v1302_v2 = vmax.f32 %v1169_v51, 0.0  ;;  %v1149_v47 = vadd.f32 %v6432_v4, %v956_v22  ;;  %v5735_v56 = vld [vmem:[#allocation6 + $0x368] sm:$0xff]   ;;  %v1296_v4 = vmax.f32 %v1153_v39, 0.0 }
 0x206   :  { %v1172_v1 = vpop.f32.mrf.mxu0  ;;  %v988_v17 = vadd.f32 %v987_v62, %v6414_v40  ;;  %v1285_v62 = vmax.f32 %v1127_v44, 0.0 }
 0x207   :  { %v1303_v3 = vmax.f32 %v1171_v58, 0.0  ;;  %v1173_v5 = vadd.f32 %v1172_v1, %v980_v52  ;;  %5190 = vmatpush3.bf16.msra.mxu1 %v5720_v53  ;;  %v989_v9 = vpop.f32.mrf.mxu1  ;;  %v1287_v53 = vmax.f32 %v1131_v35, 0.0  ;;  %v1294_v1 = vmax.f32 %v1149_v47, 0.0  ;;  %v5743_v35 = vld [vmem:[#allocation6 + $0x358] sm:$0xff]  }
 0x208   :  { %5191 = vmatprep.subr.bf16.mxu1 %v5722_v57  ;;  %v1176_v12 = vpop.f32.mrf.mxu0  ;;  %v990_v32 = vadd.f32 %v989_v9, %v6412_v37 }
 0x209   :  { %v1304_v13 = vmax.f32 %v1173_v5, 0.0  ;;  %v1177_v15 = vadd.f32 %v1176_v12, %v984_v60  ;;  %v6457_v18 = vpop.f32.mrf.mxu1  ;;  %v5135_v21 = vpack.c.bf16 %v1303_v3, %v1301_v63  ;;  %v5129_v9 = vpack.c.bf16 %v1287_v53, %v1285_v62  ;;  %v5738_v12 = vld [vmem:[#allocation6 + $0x170] sm:$0xff]  }
 0x20a   :  { %v1178_v24 = vpop.f32.mrf.mxu0  ;;  %v994_v53 = vadd.f32 %v6457_v18, %v6414_v40 }
 0x20b   :  { %v5136_v26 = vpack.c.bf16 %v1304_v13, %v1302_v2  ;;  %5192 = vmatpush3.bf16.msra.mxu1 %v5724_v6  ;;  %v1179_v30 = vadd.f32 %v1178_v24, %v986_v8  ;;  %v995_v33 = vpop.f32.mrf.mxu1  ;;  %v1305_v59 = vmax.f32 %v1177_v15, 0.0  ;;  %v5736_v2 = vld [vmem:[#allocation6 + $0x138] sm:$0xff]   ;;  %v5132_v15 = vpack.c.bf16 %v1296_v4, %v1294_v1  ;;  %v5740_v24 = vld [vmem:[#allocation6 + $0x130] sm:$0xff]   ;;  %v5748_v4 = vld [vmem:[#allocation6 + $0x120] sm:$0xff]  }
 0x20c   :  { %5193 = vmatprep.subr.bf16.mxu1 %v5726_v11  ;;  %v1180_v38 = vpop.f32.mrf.mxu0  ;;  %v996_v14 = vadd.f32 %v995_v33, %v6412_v37  ;;  %v5737_v11 = vld [vmem:[#allocation6 + $0x328] sm:$0xff]   ;;  %v5749_v1 = vld [vmem:[#allocation6 + $0x310] sm:$0xff]  }
 0x20d   :  { %2477 = vmatprep.mubr.bf16.mxu0 %v5136_v26  ;;  %v1181_v42 = vadd.f32 %v1180_v38, %v988_v17  ;;  %v6470_v43 = vpop.f32.mrf.mxu1  ;;  %v1306_v49 = vmax.f32 %v1179_v30, 0.0  ;;  %v5739_v17 = vld [vmem:[#allocation6 + $0x360] sm:$0xff]  }
 0x20e   :  { %2478 = vmatmul.mubr.bf16.vlgmr.msra.gmra.mxu0 %v5135_v21  ;;  %v1182_v34 = vpop.f32.mrf.mxu0  ;;  %v5741_v30 = vld [vmem:[#allocation6 + $0x320] sm:$0xff]  }
 0x20f   :  { %5194 = vmatpush3.bf16.msra.mxu1 %v5728_v28  ;;  %5292 = vmatpush3.bf16.msra.mxu0 %v5729_v29  ;;  %v1307_v50 = vmax.f32 %v1181_v42, 0.0  ;;  %v1183_v51 = vadd.f32 %v1182_v34, %v990_v32  ;;  %v999_v52 = vpop.f32.mrf.mxu1  ;;  %v5742_v32 = vld [vmem:[#allocation6 + $0x168] sm:$0xff]  }
 0x210   :  { %5195 = vmatprep.subr.bf16.mxu1 %v5730_v25  ;;  %5293 = vmatprep.subr.bf16.mxu0 %v5731_v36  ;;  %v6475_v27 = vpop.f32.mrf.mxu0  ;;  %v1000_v6 = vadd.f32 %v999_v52, %v6412_v37 }
 0x211   :  { %v6477_v57 = vpack.c.bf16 %v1307_v50, %v1305_v59  ;;  %v1308_v58 = vmax.f32 %v1183_v51, 0.0  ;;  %v1003_v60 = vpop.f32.mrf.mxu1  ;;  %v5744_v59 = vld [vmem:[#allocation6 + $0x128] sm:$0xff]   ;;  %v5747_v50 = vld [vmem:[#allocation6 + $0x350] sm:$0xff]  }
 0x212   :  { %v1188_v63 = vpop.f32.mrf.mxu0  ;;  %v1004_v19 = vadd.f32 %v1003_v60, %v6414_v40 }
 0x213   :  { %5196 = vmatpush3.bf16.msra.mxu1 %v5732_v46  ;;  %5294 = vmatpush3.bf16.msra.mxu0 %v5733_v48  ;;  %v6479_v3 = vpack.c.bf16 %v1308_v58, %v1306_v49  ;;  %v1189_v5 = vadd.f32 %v1188_v63, %v996_v14  ;;  %v1005_v8 = vpop.f32.mrf.mxu1  ;;  %v5745_v46 = vld [vmem:[#allocation6 + $0x318] sm:$0xff]   ;;  %v5746_v48 = vld [vmem:[#allocation6 + $0x160] sm:$0xff]  }
 0x214   :  { %5203 = vmatprep.subr.bf16.mxu1 %v5734_v55  ;;  %5295 = vmatprep.subr.bf16.mxu0 %v5735_v56  ;;  %v6482_v13 = vpop.f32.mrf.mxu0  ;;  %v1006_v28 = vadd.f32 %v1005_v8, %v6412_v37  ;;  %v998_v56 = vadd.f32 %v6470_v43, %v6414_v40 }
 0x215   :  { %v1007_v20 = vpop.f32.mrf.mxu1  ;;  %v1310_v31 = vmax.f32 %v1189_v5, 0.0 }
 0x216   :  { %1928 = vmatmul.mubr.bf16.vlgmr.msra.gmra.mxu1 %v5129_v9  ;;  %v1192_v21 = vpop.f32.mrf.mxu0  ;;  %v1008_v36 = vadd.f32 %v1007_v20, %v6414_v40 }
 0x217   :  { %5204 = vmatpush3.bf16.msra.mxu1 %v5736_v2  ;;  %2109 = vmatprep.mubr.bf16.mxu1 %v5132_v15  ;;  %v1193_v26 = vadd.f32 %v1192_v21, %v1000_v6  ;;  %v1009_v29 = vpop.f32.mrf.mxu1  ;;  %v5750_v2 = vld [vmem:[#allocation6 + $0x158] sm:$0xff]   ;;  %v5751_v6 = vld [vmem:[#allocation6 + $0x348] sm:$0xff]   ;;  %v1191_v15 = vadd.f32 %v6482_v13, %v998_v56 }
 0x218   :  { %5296 = vmatpush3.bf16.msra.mxu0 %v5737_v11  ;;  %5205 = vmatprep.subr.bf16.mxu1 %v5738_v12  ;;  %v1196_v33 = vpop.f32.mrf.mxu0  ;;  %v1010_v47 = vadd.f32 %v1009_v29, %v6412_v37  ;;  %v1187_v12 = vadd.f32 %v6475_v27, %v994_v53 }
 0x219   :  { %5297 = vmatprep.subr.bf16.mxu0 %v5739_v17  ;;  %v1312_v22 = vmax.f32 %v1193_v26, 0.0  ;;  %v1197_v25 = vadd.f32 %v1196_v33, %v1004_v19  ;;  %v6487_v38 = vpop.f32.mrf.mxu1  ;;  %v5752_v17 = vld [vmem:[#allocation6 + $0x118] sm:$0xff]   ;;  %v1311_v33 = vmax.f32 %v1191_v15, 0.0 }
 0x21a   :  { %v1198_v39 = vpop.f32.mrf.mxu0  ;;  %v1309_v13 = vmax.f32 %v1187_v12, 0.0 }
 0x21b   :  { %5206 = vmatpush3.bf16.msra.mxu1 %v5740_v24  ;;  %v5140_v42 = vpack.c.bf16 %v1312_v22, %v1310_v31  ;;  %v1199_v44 = vadd.f32 %v1198_v39, %v1006_v28  ;;  %v1015_v34 = vpop.f32.mrf.mxu1  ;;  %v1313_v51 = vmax.f32 %v1197_v25, 0.0  ;;  %v5753_v24 = vld [vmem:[#allocation6 + $0x308] sm:$0xff]   ;;  %v5754_v31 = vld [vmem:[#allocation6 + $0x150] sm:$0xff]   ;;  %v5755_v28 = vld [vmem:[#allocation6 + $0x340] sm:$0xff]  }
 0x21c   :  { %5298 = vmatpush3.bf16.msra.mxu0 %v5741_v30  ;;  %5207 = vmatprep.subr.bf16.mxu1 %v5742_v32  ;;  %v1200_v49 = vpop.f32.mrf.mxu0  ;;  %v1016_v9 = vadd.f32 %v1015_v34, %v6412_v37  ;;  %v5757_v39 = vld [vmem:[#allocation6 + $0x300] sm:$0xff]   ;;  %v5139_v53 = vpack.c.bf16 %v1311_v33, %v1309_v13 }
 0x21d   :  { %5299 = vmatprep.subr.bf16.mxu0 %v5743_v35  ;;  %2845 = vmatprep.mubr.bf16.mxu0 %v5140_v42  ;;  %v1201_v14 = vadd.f32 %v1200_v49, %v1008_v36  ;;  %v6490_v52 = vpop.f32.mrf.mxu1  ;;  %v1314_v58 = vmax.f32 %v1199_v44, 0.0  ;;  %v5756_v35 = vld [vmem:[#allocation6 + $0x110] sm:$0xff]   ;;  %v5759_v44 = vld [vmem:[#allocation6 + $0x478] sm:$0xff]  }
 0x21e   :  { %v1202_v55 = vpop.f32.mrf.mxu0 }
 0x21f   :  { %5208 = vmatpush3.bf16.msra.mxu1 %v5744_v59  ;;  %v1315_v60 = vmax.f32 %v1201_v14, 0.0  ;;  %v1203_v62 = vadd.f32 %v1202_v55, %v1010_v47  ;;  %v1019_v63 = vpop.f32.mrf.mxu1  ;;  %v5758_v59 = vld [vmem:[#allocation6 + $0x148] sm:$0xff]   ;;  %v970_v14 = vadd.f32 %v6441_v16, %v6412_v37  ;;  %v5762_v16 = vld [vmem:[#allocation6 + $0x140] sm:$0xff]  }
 0x220   :  { %5300 = vmatpush3.bf16.msra.mxu0 %v5745_v46  ;;  %5209 = vmatprep.subr.bf16.mxu1 %v5746_v48  ;;  %v6496_v5 = vpop.f32.mrf.mxu0  ;;  %v1020_v20 = vadd.f32 %v1019_v63, %v6412_v37  ;;  %v5760_v55 = vld [vmem:[#allocation6 + $0x108] sm:$0xff]   ;;  %v5761_v63 = vld [vmem:[#allocation6 + $0x438] sm:$0xff]  }
 0x221   :  { %5301 = vmatprep.subr.bf16.mxu0 %v5747_v50  ;;  %v6498_v8 = vpack.c.bf16 %v1315_v60, %v1313_v51  ;;  %v1316_v18 = vmax.f32 %v1203_v62, 0.0  ;;  %v1023_v11 = vpop.f32.mrf.mxu1  ;;  %v958_v50 = vadd.f32 %v6426_v54, %v6414_v40  ;;  %v954_v60 = vadd.f32 %v6416_v41, %v6414_v40 }
 0x222   :  { %v1208_v43 = vpop.f32.mrf.mxu0  ;;  %v1024_v27 = vadd.f32 %v1023_v11, %v6414_v40  ;;  %v966_v62 = vadd.f32 %v6434_v7, %v6412_v37 }
 0x223   :  { %5210 = vmatpush3.bf16.msra.mxu1 %v5748_v4  ;;  %v6503_v19 = vpack.c.bf16 %v1316_v18, %v1314_v58  ;;  %v1025_v21 = vpop.f32.mrf.mxu1  ;;  %v1209_v29 = vadd.f32 %v1208_v43, %v1016_v9  ;;  %v1151_v54 = vadd.f32 %v6436_v10, %v958_v50  ;;  %v1147_v41 = vadd.f32 %v6430_v61, %v954_v60  ;;  %v5764_v10 = vld [vmem:[#allocation6 + $0x100] sm:$0xff]   ;;  %v5767_v61 = vld [vmem:[#allocation6 + $0x468] sm:$0xff]   ;;  %v5772_v50 = vld [vmem:[#allocation6 + $0x1b0] sm:$0xff]  }
 0x224   :  { %5302 = vmatpush3.bf16.msra.mxu0 %v5749_v1  ;;  %5211 = vmatprep.subr.bf16.mxu1 %v5750_v2  ;;  %v6506_v26 = vpop.f32.mrf.mxu0  ;;  %v1026_v25 = vadd.f32 %v1025_v21, %v6412_v37  ;;  %v1163_v2 = vadd.f32 %v6447_v0, %v970_v14  ;;  %v1159_v7 = vadd.f32 %v6443_v23, %v966_v62 }
 0x225   :  { %5303 = vmatprep.subr.bf16.mxu0 %v5751_v6  ;;  %v1027_v30 = vpop.f32.mrf.mxu1  ;;  %v1318_v47 = vmax.f32 %v1209_v29, 0.0  ;;  %v5763_v6 = vld [vmem:[#allocation6 + $0x470] sm:$0xff]   ;;  %v1295_v0 = vmax.f32 %v1151_v54, 0.0 }
 0x226   :  { %v1212_v32 = vpop.f32.mrf.mxu0  ;;  %v1028_v48 = vadd.f32 %v1027_v30, %v6414_v40  ;;  %v1300_v29 = vmax.f32 %v1163_v2, 0.0  ;;  %v1298_v33 = vmax.f32 %v1159_v7, 0.0 }
 0x227   :  { %5212 = vmatpush3.bf16.msra.mxu1 %v5752_v17  ;;  %v1213_v22 = vadd.f32 %v1212_v32, %v1020_v20  ;;  %v1029_v36 = vpop.f32.mrf.mxu1  ;;  %v1293_v32 = vmax.f32 %v1147_v41, 0.0  ;;  %v5779_v41 = vld [vmem:[#allocation6 + $0x450] sm:$0xff]  }
 0x228   :  { %5304 = vmatpush3.bf16.msra.mxu0 %v5753_v24  ;;  %5213 = vmatprep.subr.bf16.mxu1 %v5754_v31  ;;  %v1216_v42 = vpop.f32.mrf.mxu0  ;;  %v1030_v4 = vadd.f32 %v1029_v36, %v6412_v37  ;;  %v5765_v24 = vld [vmem:[#allocation6 + $0x430] sm:$0xff]   ;;  %v5766_v31 = vld [vmem:[#allocation6 + $0x1f8] sm:$0xff]  }
 0x229   :  { %5305 = vmatprep.subr.bf16.mxu0 %v5755_v28  ;;  %v1320_v34 = vmax.f32 %v1213_v22, 0.0  ;;  %v1217_v46 = vadd.f32 %v1216_v42, %v1024_v27  ;;  %v6511_v49 = vpop.f32.mrf.mxu1  ;;  %v5131_v36 = vpack.c.bf16 %v1295_v0, %v1293_v32  ;;  %v5780_v0 = vld [vmem:[#allocation6 + $0x1a0] sm:$0xff]  }
 0x22a   :  { %v1218_v51 = vpop.f32.mrf.mxu0 }
 0x22b   :  { %5214 = vmatpush3.bf16.msra.mxu1 %v5756_v35  ;;  %v1219_v56 = vadd.f32 %v1218_v51, %v1026_v25  ;;  %v6518_v58 = vpop.f32.mrf.mxu1  ;;  %v5144_v18 = vpack.c.bf16 %v1320_v34, %v1318_v47  ;;  %v1321_v9 = vmax.f32 %v1217_v46, 0.0  ;;  %v5768_v35 = vld [vmem:[#allocation6 + $0x1b8] sm:$0xff]   ;;  %v5771_v47 = vld [vmem:[#allocation6 + $0x460] sm:$0xff]  }
 0x22c   :  { %5306 = vmatpush3.bf16.msra.mxu0 %v5757_v39  ;;  %5215 = vmatprep.subr.bf16.mxu1 %v5758_v59  ;;  %v1220_v1 = vpop.f32.mrf.mxu0  ;;  %v5769_v39 = vld [vmem:[#allocation6 + $0x428] sm:$0xff]   ;;  %v5770_v59 = vld [vmem:[#allocation6 + $0x1f0] sm:$0xff]  }
 0x22d   :  { %5335 = vmatprep.subr.bf16.mxu0 %v5759_v44  ;;  %v1221_v11 = vadd.f32 %v1220_v1, %v1028_v48  ;;  %v6526_v43 = vpop.f32.mrf.mxu1  ;;  %v1322_v15 = vmax.f32 %v1219_v56, 0.0  ;;  %v5134_v44 = vpack.c.bf16 %v1300_v29, %v1298_v33  ;;  %v5783_v33 = vld [vmem:[#allocation6 + $0x448] sm:$0xff]  }
 0x22e   :  { %v1222_v12 = vpop.f32.mrf.mxu0 }
 0x22f   :  { %5216 = vmatpush3.bf16.msra.mxu1 %v5760_v55  ;;  %2846 = vmatmul.mubr.bf16.vlgmr.msra.gmra.mxu0 %v5139_v53  ;;  %v1323_v17 = vmax.f32 %v1221_v11, 0.0  ;;  %v1223_v20 = vadd.f32 %v1222_v12, %v1030_v4  ;;  %v6530_v21 = vpop.f32.mrf.mxu1  ;;  %v5773_v53 = vld [vmem:[#allocation6 + $0x420] sm:$0xff]   ;;  %v5774_v55 = vld [vmem:[#allocation6 + $0x1e8] sm:$0xff]   ;;  %v5775_v4 = vld [vmem:[#allocation6 + $0x458] sm:$0xff]  }
 0x230   :  { %5336 = vmatpush3.bf16.msra.mxu0 %v5761_v63  ;;  %5217 = vmatprep.subr.bf16.mxu1 %v5762_v16  ;;  %v6532_v28 = vpop.f32.mrf.mxu0  ;;  %v5776_v16 = vld [vmem:[#allocation6 + $0x1a8] sm:$0xff]  }
 0x231   :  { %5337 = vmatprep.subr.bf16.mxu0 %v5763_v6  ;;  %3213 = vmatprep.mubr.bf16.mxu0 %v5144_v18  ;;  %v6534_v23 = vpack.c.bf16 %v1323_v17, %v1321_v9  ;;  %v1324_v27 = vmax.f32 %v1223_v20, 0.0  ;;  %v1043_v30 = vpop.f32.mrf.mxu1  ;;  %v5777_v18 = vld [vmem:[#allocation6 + $0x418] sm:$0xff]   ;;  %v5778_v9 = vld [vmem:[#allocation6 + $0x1e0] sm:$0xff]   ;;  %v1018_v20 = vadd.f32 %v6490_v52, %v6414_v40  ;;  %v1040_v52 = vadd.f32 %v6530_v21, %v6412_v37 }
 0x232   :  { %v6536_v13 = vpop.f32.mrf.mxu0  ;;  %v1044_v34 = vadd.f32 %v1043_v30, %v6414_v40  ;;  %v5782_v30 = vld [vmem:[#allocation6 + $0x1d8] sm:$0xff]  }
 0x233   :  { %5218 = vmatpush3.bf16.msra.mxu1 %v5764_v10  ;;  %v6538_v22 = vpack.c.bf16 %v1324_v27, %v1322_v15  ;;  %v1045_v25 = vpop.f32.mrf.mxu1  ;;  %v1014_v15 = vadd.f32 %v6487_v38, %v6414_v40  ;;  %v5781_v27 = vld [vmem:[#allocation6 + $0x410] sm:$0xff]   ;;  %v1036_v38 = vadd.f32 %v6518_v58, %v6412_v37  ;;  %v5785_v58 = vld [vmem:[#allocation6 + $0x408] sm:$0xff]  }
 0x234   :  { %5338 = vmatpush3.bf16.msra.mxu0 %v5765_v24  ;;  %5225 = vmatprep.subr.bf16.mxu1 %v5766_v31  ;;  %v6540_v42 = vpop.f32.mrf.mxu0  ;;  %v1046_v51 = vadd.f32 %v1045_v25, %v6412_v37 }
 0x235   :  { %5339 = vmatprep.subr.bf16.mxu0 %v5767_v61  ;;  %v1047_v46 = vpop.f32.mrf.mxu1 }
 0x236   :  { %2110 = vmatmul.mubr.bf16.vlgmr.msra.gmra.mxu1 %v5131_v36  ;;  %v6543_v48 = vpop.f32.mrf.mxu0  ;;  %v1048_v62 = vadd.f32 %v1047_v46, %v6414_v40 }
 0x237   :  { %5226 = vmatpush3.bf16.msra.mxu1 %v5768_v35  ;;  %2293 = vmatprep.mubr.bf16.mxu1 %v5134_v44  ;;  %v1049_v14 = vpop.f32.mrf.mxu1  ;;  %v1211_v44 = vadd.f32 %v6506_v26, %v1018_v20  ;;  %v5793_v20 = vld [vmem:[#allocation6 + $0x538] sm:$0xff]  }
 0x238   :  { %5340 = vmatpush3.bf16.msra.mxu0 %v5769_v39  ;;  %5227 = vmatprep.subr.bf16.mxu1 %v5770_v59  ;;  %v1236_v56 = vpop.f32.mrf.mxu0  ;;  %v1050_v2 = vadd.f32 %v1049_v14, %v6412_v37  ;;  %v1207_v59 = vadd.f32 %v6496_v5, %v1014_v15  ;;  %v1229_v14 = vadd.f32 %v6536_v13, %v1036_v38  ;;  %v5791_v13 = vld [vmem:[#allocation6 + $0x578] sm:$0xff]   ;;  %v5796_v38 = vld [vmem:[#allocation6 + $0x180] sm:$0xff]  }
 0x239   :  { %5341 = vmatprep.subr.bf16.mxu0 %v5771_v47  ;;  %v1237_v60 = vadd.f32 %v1236_v56, %v1044_v34  ;;  %v6547_v54 = vpop.f32.mrf.mxu1  ;;  %v5784_v47 = vld [vmem:[#allocation6 + $0x198] sm:$0xff]  }
 0x23a   :  { %v1238_v63 = vpop.f32.mrf.mxu0  ;;  %v1317_v56 = vmax.f32 %v1207_v59, 0.0  ;;  %v5797_v59 = vld [vmem:[#allocation6 + $0x530] sm:$0xff]  }
 0x23b   :  { %5228 = vmatpush3.bf16.msra.mxu1 %v5772_v50  ;;  %v1239_v1 = vadd.f32 %v1238_v63, %v1046_v51  ;;  %v6550_v6 = vpop.f32.mrf.mxu1  ;;  %v1329_v12 = vmax.f32 %v1237_v60, 0.0  ;;  %v5786_v50 = vld [vmem:[#allocation6 + $0x1d0] sm:$0xff]   ;;  %v5787_v51 = vld [vmem:[#allocation6 + $0x440] sm:$0xff]  }
 0x23c   :  { %5342 = vmatpush3.bf16.msra.mxu0 %v5773_v53  ;;  %5229 = vmatprep.subr.bf16.mxu1 %v5774_v55  ;;  %v1240_v11 = vpop.f32.mrf.mxu0  ;;  %v1233_v53 = vadd.f32 %v6543_v48, %v1040_v52  ;;  %v5788_v60 = vld [vmem:[#allocation6 + $0x190] sm:$0xff]   ;;  %v5789_v63 = vld [vmem:[#allocation6 + $0x400] sm:$0xff]   ;;  %v1326_v48 = vmax.f32 %v1229_v14, 0.0  ;;  %v5801_v14 = vld [vmem:[#allocation6 + $0x528] sm:$0xff]  }
 0x23d   :  { %5343 = vmatprep.subr.bf16.mxu0 %v5775_v4  ;;  %v1241_v7 = vadd.f32 %v1240_v11, %v1048_v62  ;;  %v6552_v10 = vpop.f32.mrf.mxu1  ;;  %v1330_v24 = vmax.f32 %v1239_v1, 0.0  ;;  %v1319_v4 = vmax.f32 %v1211_v44, 0.0  ;;  %v5798_v44 = vld [vmem:[#allocation6 + $0x2f8] sm:$0xff]  }
 0x23e   :  { %v1242_v17 = vpop.f32.mrf.mxu0 }
 0x23f   :  { %5230 = vmatpush3.bf16.msra.mxu1 %v5776_v16  ;;  %v1331_v31 = vmax.f32 %v1241_v7, 0.0  ;;  %v1243_v29 = vadd.f32 %v1242_v17, %v1050_v2  ;;  %v6558_v61 = vpop.f32.mrf.mxu1  ;;  %v5790_v16 = vld [vmem:[#allocation6 + $0x1c8] sm:$0xff]  }
 0x240   :  { %5344 = vmatpush3.bf16.msra.mxu0 %v5777_v18  ;;  %5231 = vmatprep.subr.bf16.mxu1 %v5778_v9  ;;  %v6560_v32 = vpop.f32.mrf.mxu0  ;;  %v1328_v18 = vmax.f32 %v1233_v53, 0.0  ;;  %v5792_v7 = vld [vmem:[#allocation6 + $0x188] sm:$0xff]   ;;  %v5802_v53 = vld [vmem:[#allocation6 + $0x2f0] sm:$0xff]  }
 0x241   :  { %5345 = vmatprep.subr.bf16.mxu0 %v5779_v41  ;;  %v6566_v35 = vpack.c.bf16 %v1331_v31, %v1329_v12  ;;  %v1332_v25 = vmax.f32 %v1243_v29, 0.0  ;;  %v1063_v36 = vpop.f32.mrf.mxu1  ;;  %v5143_v12 = vpack.c.bf16 %v1319_v4, %v1317_v56  ;;  %v5795_v31 = vld [vmem:[#allocation6 + $0x570] sm:$0xff]   ;;  %v5805_v56 = vld [vmem:[#allocation6 + $0x520] sm:$0xff]   ;;  %v5806_v4 = vld [vmem:[#allocation6 + $0x2e8] sm:$0xff]  }
 0x242   :  { %v6568_v39 = vpop.f32.mrf.mxu0  ;;  %v1064_v5 = vadd.f32 %v1063_v36, %v6414_v40  ;;  %v5148_v29 = vpack.c.bf16 %v1328_v18, %v1326_v48  ;;  %v5814_v48 = vld [vmem:[#allocation6 + $0x2d8] sm:$0xff]   ;;  %v5815_v18 = vld [vmem:[#allocation6 + $0x548] sm:$0xff]  }
 0x243   :  { %5232 = vmatpush3.bf16.msra.mxu1 %v5780_v0  ;;  %v6572_v34 = vpack.c.bf16 %v1332_v25, %v1330_v24  ;;  %v1065_v46 = vpop.f32.mrf.mxu1  ;;  %v5794_v0 = vld [vmem:[#allocation6 + $0x1c0] sm:$0xff]  }
 0x244   :  { %5346 = vmatpush3.bf16.msra.mxu0 %v5781_v27  ;;  %5233 = vmatprep.subr.bf16.mxu1 %v5782_v30  ;;  %v6574_v21 = vpop.f32.mrf.mxu0  ;;  %v1066_v62 = vadd.f32 %v1065_v46, %v6412_v37 }
 0x245   :  { %5347 = vmatprep.subr.bf16.mxu0 %v5783_v33  ;;  %v1067_v55 = vpop.f32.mrf.mxu1 }
 0x246   :  { %v6579_v26 = vpop.f32.mrf.mxu0  ;;  %v1068_v11 = vadd.f32 %v1067_v55, %v6414_v40  ;;  %v5804_v55 = vld [vmem:[#allocation6 + $0x2b0] sm:$0xff]  }
 0x247   :  { %5234 = vmatpush3.bf16.msra.mxu1 %v5784_v47  ;;  %v1069_v2 = vpop.f32.mrf.mxu1  ;;  %v5799_v47 = vld [vmem:[#allocation6 + $0x568] sm:$0xff]  }
 0x248   :  { %5348 = vmatpush3.bf16.msra.mxu0 %v5785_v58  ;;  %5235 = vmatprep.subr.bf16.mxu1 %v5786_v50  ;;  %v1256_v1 = vpop.f32.mrf.mxu0  ;;  %v1070_v17 = vadd.f32 %v1069_v2, %v6412_v37  ;;  %v5800_v50 = vld [vmem:[#allocation6 + $0x2b8] sm:$0xff]   ;;  %v5812_v2 = vld [vmem:[#allocation6 + $0x2a0] sm:$0xff]  }
 0x249   :  { %5349 = vmatprep.subr.bf16.mxu0 %v5787_v51  ;;  %v1257_v9 = vadd.f32 %v1256_v1, %v1064_v5  ;;  %v5803_v5 = vld [vmem:[#allocation6 + $0x560] sm:$0xff]   ;;  %v5811_v1 = vld [vmem:[#allocation6 + $0x550] sm:$0xff]  }
 0x24a   :  { %v1258_v41 = vpop.f32.mrf.mxu0 }
 0x24b   :  { %5236 = vmatpush3.bf16.msra.mxu1 %v5788_v60  ;;  %v1259_v15 = vadd.f32 %v1258_v41, %v1066_v62  ;;  %v1337_v27 = vmax.f32 %v1257_v9, 0.0  ;;  %v5807_v60 = vld [vmem:[#allocation6 + $0x558] sm:$0xff]   ;;  %v5808_v62 = vld [vmem:[#allocation6 + $0x2a8] sm:$0xff]   ;;  %v1056_v9 = vadd.f32 %v6550_v6, %v6412_v37 }
 0x24c   :  { %5350 = vmatpush3.bf16.msra.mxu0 %v5789_v63  ;;  %5237 = vmatprep.subr.bf16.mxu1 %v5790_v16  ;;  %v1260_v24 = vpop.f32.mrf.mxu0  ;;  %v5809_v63 = vld [vmem:[#allocation6 + $0x518] sm:$0xff]   ;;  %v5810_v16 = vld [vmem:[#allocation6 + $0x2e0] sm:$0xff]  }
 0x24d   :  { %5379 = vmatprep.subr.bf16.mxu0 %v5791_v13  ;;  %v1261_v30 = vadd.f32 %v1260_v24, %v1068_v11  ;;  %v1338_v52 = vmax.f32 %v1259_v15, 0.0  ;;  %v5813_v13 = vld [vmem:[#allocation6 + $0x510] sm:$0xff]   ;;  %v1060_v11 = vadd.f32 %v6558_v61, %v6412_v37  ;;  %v5819_v15 = vld [vmem:[#allocation6 + $0x540] sm:$0xff]   ;;  %v5822_v24 = vld [vmem:[#allocation6 + $0x2c8] sm:$0xff]  }
 0x24e   :  { %v1262_v33 = vpop.f32.mrf.mxu0  ;;  %v5820_v61 = vld [vmem:[#allocation6 + $0x290] sm:$0xff]  }
 0x24f   :  { %5238 = vmatpush3.bf16.msra.mxu1 %v5792_v7  ;;  %3214 = vmatmul.mubr.bf16.vlgmr.msra.gmra.mxu0 %v5143_v12  ;;  %v1339_v25 = vmax.f32 %v1261_v30, 0.0  ;;  %v1263_v36 = vadd.f32 %v1262_v33, %v1070_v17  ;;  %v5816_v12 = vld [vmem:[#allocation6 + $0x298] sm:$0xff]   ;;  %v5818_v7 = vld [vmem:[#allocation6 + $0x2d0] sm:$0xff]   ;;  %v1249_v17 = vadd.f32 %v6568_v39, %v1056_v9  ;;  %v5824_v30 = vld [vmem:[#allocation6 + $0x288] sm:$0xff]   ;;  %v1058_v9 = vadd.f32 %v6552_v10, %v6414_v40 }
 0x250   :  { %5380 = vmatpush3.bf16.msra.mxu0 %v5793_v20  ;;  %5239 = vmatprep.subr.bf16.mxu1 %v5794_v0  ;;  %v1253_v20 = vadd.f32 %v6579_v26, %v1060_v11  ;;  %v5825_v39 = vld [vmem:[#allocation6 + $0x638] sm:$0xff]   ;;  %v5826_v33 = vld [vmem:[#allocation6 + $0x2c0] sm:$0xff]   ;;  %v5827_v26 = vld [vmem:[#allocation6 + $0x670] sm:$0xff]  }
 0x251   :  { %5381 = vmatprep.subr.bf16.mxu0 %v5795_v31  ;;  %3581 = vmatprep.mubr.bf16.mxu0 %v5148_v29  ;;  %v6584_v46 = vpack.c.bf16 %v1339_v25, %v1337_v27  ;;  %v1340_v58 = vmax.f32 %v1263_v36, 0.0  ;;  %v1334_v31 = vmax.f32 %v1249_v17, 0.0  ;;  %v5829_v25 = vld [vmem:[#allocation6 + $0x630] sm:$0xff]   ;;  %v5830_v36 = vld [vmem:[#allocation6 + $0x3f8] sm:$0xff]   ;;  %v5847_v11 = vld [vmem:[#allocation6 + $0x648] sm:$0xff]  }
 0x252   :  { %v1336_v29 = vmax.f32 %v1253_v20, 0.0  ;;  %v5851_v20 = vld [vmem:[#allocation6 + $0x640] sm:$0xff]  }
 0x253   :  { %5240 = vmatpush3.bf16.msra.mxu1 %v5796_v38  ;;  %v6586_v51 = vpack.c.bf16 %v1340_v58, %v1338_v52  ;;  %v5828_v52 = vld [vmem:[#allocation6 + $0x280] sm:$0xff]   ;;  %v5833_v58 = vld [vmem:[#allocation6 + $0x628] sm:$0xff]  }
 0x254   :  { %5382 = vmatpush3.bf16.msra.mxu0 %v5797_v59  ;;  %5269 = vmatprep.subr.bf16.mxu1 %v5798_v44  ;;  %v5152_v38 = vpack.c.bf16 %v1336_v29, %v1334_v31  ;;  %v5831_v59 = vld [vmem:[#allocation6 + $0x668] sm:$0xff]   ;;  %v6602_v44 = vpop.f32.mrf.mxu1  ;;  %v5855_v29 = vld [vmem:[#allocation6 + $0x778] sm:$0xff]  }
 0x255   :  { %5383 = vmatprep.subr.bf16.mxu0 %v5799_v47  ;;  %v5832_v47 = vld [vmem:[#allocation6 + $0x3b8] sm:$0xff]  }
 0x256   :  { %2294 = vmatmul.mubr.bf16.vlgmr.msra.gmra.mxu1 %v6450_v45  ;;  %v1034_v45 = vadd.f32 %v6511_v49, %v6414_v40 }
 0x257   :  { %5270 = vmatpush3.bf16.msra.mxu1 %v5800_v50  ;;  %2661 = vmatprep.mubr.bf16.mxu1 %v6479_v3  ;;  %v1038_v3 = vadd.f32 %v6526_v43, %v6414_v40  ;;  %v5817_v43 = vld [vmem:[#allocation6 + $0x508] sm:$0xff]   ;;  %v5834_v50 = vld [vmem:[#allocation6 + $0x3f0] sm:$0xff]  }
 0x258   :  { %5384 = vmatpush3.bf16.msra.mxu0 %v5801_v14  ;;  %5271 = vmatprep.subr.bf16.mxu1 %v5802_v53  ;;  %v1227_v41 = vadd.f32 %v6532_v28, %v1034_v45  ;;  %v5821_v28 = vld [vmem:[#allocation6 + $0x500] sm:$0xff]   ;;  %v1075_v53 = vpop.f32.mrf.mxu1  ;;  %v5843_v45 = vld [vmem:[#allocation6 + $0x650] sm:$0xff]  }
 0x259   :  { %5385 = vmatprep.subr.bf16.mxu0 %v5803_v5  ;;  %v1231_v49 = vadd.f32 %v6540_v42, %v1038_v3  ;;  %v5823_v42 = vld [vmem:[#allocation6 + $0x678] sm:$0xff]   ;;  %v5835_v14 = vld [vmem:[#allocation6 + $0x660] sm:$0xff]   ;;  %v6605_v5 = vpop.f32.mrf.mxu0 }
 0x25a   :  { %v1325_v6 = vmax.f32 %v1227_v41, 0.0  ;;  %v1076_v41 = vadd.f32 %v1075_v53, %v6412_v37  ;;  %v5869_v53 = vld [vmem:[#allocation6 + $0x720] sm:$0xff]  }
 0x25b   :  { %5272 = vmatpush3.bf16.msra.mxu1 %v5804_v55  ;;  %v1327_v0 = vmax.f32 %v1231_v49, 0.0  ;;  %v5836_v55 = vld [vmem:[#allocation6 + $0x3b0] sm:$0xff]  }
 0x25c   :  { %5386 = vmatpush3.bf16.msra.mxu0 %v5805_v56  ;;  %5273 = vmatprep.subr.bf16.mxu1 %v5806_v4  ;;  %v5837_v56 = vld [vmem:[#allocation6 + $0x620] sm:$0xff]   ;;  %v5838_v4 = vld [vmem:[#allocation6 + $0x3e8] sm:$0xff]  }
 0x25d   :  { %5387 = vmatprep.subr.bf16.mxu0 %v5807_v60  ;;  %v5147_v27 = vpack.c.bf16 %v1327_v0, %v1325_v6  ;;  %v5839_v60 = vld [vmem:[#allocation6 + $0x658] sm:$0xff]   ;;  %v5852_v0 = vld [vmem:[#allocation6 + $0x390] sm:$0xff]  }
 0x25f   :  { %5274 = vmatpush3.bf16.msra.mxu1 %v5808_v62  ;;  %v6608_v62 = vpop.f32.mrf.mxu1 }
 0x260   :  { %5388 = vmatpush3.bf16.msra.mxu0 %v5809_v63  ;;  %5275 = vmatprep.subr.bf16.mxu1 %v5810_v16  ;;  %v1268_v63 = vpop.f32.mrf.mxu0  ;;  %v5840_v16 = vld [vmem:[#allocation6 + $0x3a8] sm:$0xff]  }
 0x261   :  { %5389 = vmatprep.subr.bf16.mxu0 %v5811_v1  ;;  %v5842_v1 = vld [vmem:[#allocation6 + $0x3e0] sm:$0xff]   ;;  %v1079_v3 = vpop.f32.mrf.mxu1  ;;  %v1269_v10 = vadd.f32 %v1268_v63, %v1076_v41  ;;  %v5884_v41 = vld [vmem:[#allocation6 + $0x490] sm:$0xff]  }
 0x262   :  { %v1080_v49 = vadd.f32 %v1079_v3, %v6412_v37  ;;  %v5874_v63 = vld [vmem:[#allocation6 + $0x4e0] sm:$0xff]   ;;  %v5879_v3 = vld [vmem:[#allocation6 + $0x748] sm:$0xff]  }
 0x263   :  { %5276 = vmatpush3.bf16.msra.mxu1 %v5812_v2  ;;  %v5844_v2 = vld [vmem:[#allocation6 + $0x3a0] sm:$0xff]   ;;  %v1342_v31 = vmax.f32 %v1269_v10, 0.0  ;;  %v5894_v10 = vld [vmem:[#allocation6 + $0x5e8] sm:$0xff]  }
 0x264   :  { %5390 = vmatpush3.bf16.msra.mxu0 %v5813_v13  ;;  %5277 = vmatprep.subr.bf16.mxu1 %v5814_v48  ;;  %v5845_v13 = vld [vmem:[#allocation6 + $0x610] sm:$0xff]   ;;  %v5846_v48 = vld [vmem:[#allocation6 + $0x3d8] sm:$0xff]  }
 0x265   :  { %5391 = vmatprep.subr.bf16.mxu0 %v5815_v18  ;;  %v1054_v18 = vadd.f32 %v6547_v54, %v6414_v40  ;;  %v1251_v54 = vadd.f32 %v6574_v21, %v1058_v9  ;;  %v5857_v21 = vld [vmem:[#allocation6 + $0x738] sm:$0xff]  }
 0x267   :  { %5278 = vmatpush3.bf16.msra.mxu1 %v5816_v12  ;;  %v1247_v17 = vadd.f32 %v6560_v32, %v1054_v18  ;;  %v5856_v32 = vld [vmem:[#allocation6 + $0x388] sm:$0xff]  }
 0x268   :  { %5392 = vmatpush3.bf16.msra.mxu0 %v5817_v43  ;;  %5279 = vmatprep.subr.bf16.mxu1 %v5818_v7  ;;  %v5848_v43 = vld [vmem:[#allocation6 + $0x398] sm:$0xff]   ;;  %v5849_v7 = vld [vmem:[#allocation6 + $0x608] sm:$0xff]  }
 0x269   :  { %5393 = vmatprep.subr.bf16.mxu0 %v5819_v15  ;;  %v5850_v15 = vld [vmem:[#allocation6 + $0x3d0] sm:$0xff]  }
 0x26b   :  { %5280 = vmatpush3.bf16.msra.mxu1 %v5820_v61  ;;  %v5853_v61 = vld [vmem:[#allocation6 + $0x600] sm:$0xff]  }
 0x26c   :  { %5394 = vmatpush3.bf16.msra.mxu0 %v5821_v28  ;;  %5281 = vmatprep.subr.bf16.mxu1 %v5822_v24  ;;  %v5854_v28 = vld [vmem:[#allocation6 + $0x3c8] sm:$0xff]   ;;  %v1333_v24 = vmax.f32 %v1247_v17, 0.0  ;;  %v5891_v17 = vld [vmem:[#allocation6 + $0x5b8] sm:$0xff]  }
 0x26d   :  { %5423 = vmatprep.subr.bf16.mxu0 %v5823_v42  ;;  %v1335_v42 = vmax.f32 %v1251_v54, 0.0  ;;  %v5892_v54 = vld [vmem:[#allocation6 + $0x5f0] sm:$0xff]  }
 0x26f   :  { %5282 = vmatpush3.bf16.msra.mxu1 %v5824_v30  ;;  %3582 = vmatmul.mubr.bf16.vlgmr.msra.gmra.mxu0 %v5147_v27  ;;  %v5858_v30 = vld [vmem:[#allocation6 + $0x3c0] sm:$0xff]  }
 0x270   :  { %5424 = vmatpush3.bf16.msra.mxu0 %v5825_v39  ;;  %5283 = vmatprep.subr.bf16.mxu1 %v5826_v33  ;;  %v5151_v39 = vpack.c.bf16 %v1335_v42, %v1333_v24  ;;  %v5899_v24 = vld [vmem:[#allocation6 + $0x598] sm:$0xff]   ;;  %v5900_v42 = vld [vmem:[#allocation6 + $0x5d0] sm:$0xff]  }
 0x271   :  { %5425 = vmatprep.subr.bf16.mxu0 %v5827_v26  ;;  %3949 = vmatprep.mubr.bf16.mxu0 %v5152_v38  ;;  %v5859_v26 = vld [vmem:[#allocation6 + $0x770] sm:$0xff]   ;;  %v5860_v38 = vld [vmem:[#allocation6 + $0x380] sm:$0xff]  }
 0x273   :  { %5284 = vmatpush3.bf16.msra.mxu1 %v5828_v52  ;;  %v5861_v52 = vld [vmem:[#allocation6 + $0x730] sm:$0xff]  }
 0x274   :  { %5426 = vmatpush3.bf16.msra.mxu0 %v5829_v25  ;;  %5313 = vmatprep.subr.bf16.mxu1 %v5830_v36  ;;  %v5862_v25 = vld [vmem:[#allocation6 + $0x4f8] sm:$0xff]   ;;  %v5863_v36 = vld [vmem:[#allocation6 + $0x768] sm:$0xff]  }
 0x275   :  { %5427 = vmatprep.subr.bf16.mxu0 %v5831_v59  ;;  %v5864_v59 = vld [vmem:[#allocation6 + $0x4b8] sm:$0xff]  }
 0x276   :  { %2662 = vmatmul.mubr.bf16.vlgmr.msra.gmra.mxu1 %v6477_v57  ;;  %v5841_v57 = vld [vmem:[#allocation6 + $0x618] sm:$0xff]  }
 0x277   :  { %5314 = vmatpush3.bf16.msra.mxu1 %v5832_v47  ;;  %3029 = vmatprep.mubr.bf16.mxu1 %v6503_v19  ;;  %v6610_v19 = vpop.f32.mrf.mxu0  ;;  %v5865_v47 = vld [vmem:[#allocation6 + $0x728] sm:$0xff]  }
 0x278   :  { %5428 = vmatpush3.bf16.msra.mxu0 %v5833_v58  ;;  %5315 = vmatprep.subr.bf16.mxu1 %v5834_v50  ;;  %v5866_v58 = vld [vmem:[#allocation6 + $0x4f0] sm:$0xff]   ;;  %v5867_v50 = vld [vmem:[#allocation6 + $0x760] sm:$0xff]  }
 0x279   :  { %5429 = vmatprep.subr.bf16.mxu0 %v5835_v14  ;;  %v1272_v12 = vpop.f32.mrf.mxu0  ;;  %v5868_v14 = vld [vmem:[#allocation6 + $0x4b0] sm:$0xff]  }
 0x27a   :  { %v1273_v6 = vadd.f32 %v1272_v12, %v1080_v49 }
 0x27b   :  { %5316 = vmatpush3.bf16.msra.mxu1 %v5836_v55  ;;  %v5870_v55 = vld [vmem:[#allocation6 + $0x4e8] sm:$0xff]  }
 0x27c   :  { %5430 = vmatpush3.bf16.msra.mxu0 %v5837_v56  ;;  %5317 = vmatprep.subr.bf16.mxu1 %v5838_v4  ;;  %v1344_v27 = vmax.f32 %v1273_v6, 0.0  ;;  %v5871_v56 = vld [vmem:[#allocation6 + $0x758] sm:$0xff]   ;;  %v5872_v4 = vld [vmem:[#allocation6 + $0x4a8] sm:$0xff]  }
 0x27d   :  { %5431 = vmatprep.subr.bf16.mxu0 %v5839_v60  ;;  %v5873_v60 = vld [vmem:[#allocation6 + $0x718] sm:$0xff]   ;;  %v5895_v6 = vld [vmem:[#allocation6 + $0x5a8] sm:$0xff]  }
 0x27e   :  { %v5156_v33 = vpack.c.bf16 %v1344_v27, %v1342_v31  ;;  %v5902_v31 = vld [vmem:[#allocation6 + $0x5c8] sm:$0xff]   ;;  %v5905_v27 = vld [vmem:[#allocation6 + $0x580] sm:$0xff]  }
 0x27f   :  { %5318 = vmatpush3.bf16.msra.mxu1 %v5840_v16  ;;  %v5875_v16 = vld [vmem:[#allocation6 + $0x750] sm:$0xff]  }
 0x280   :  { %5432 = vmatpush3.bf16.msra.mxu0 %v5841_v57  ;;  %5319 = vmatprep.subr.bf16.mxu1 %v5842_v1  ;;  %v5878_v57 = vld [vmem:[#allocation6 + $0x4d8] sm:$0xff]   ;;  %v1074_v1 = vadd.f32 %v6602_v44, %v6414_v40  ;;  %v5885_v44 = vld [vmem:[#allocation6 + $0x700] sm:$0xff]  }
 0x281   :  { %5433 = vmatprep.subr.bf16.mxu0 %v5843_v45  ;;  %v1078_v45 = vadd.f32 %v6608_v62, %v6414_v40  ;;  %v5886_v62 = vld [vmem:[#allocation6 + $0x4c8] sm:$0xff]  }
 0x282   :  { %v1267_v18 = vadd.f32 %v6605_v5, %v1074_v1  ;;  %v5889_v5 = vld [vmem:[#allocation6 + $0x480] sm:$0xff]  }
 0x283   :  { %5320 = vmatpush3.bf16.msra.mxu1 %v5844_v2  ;;  %v5880_v2 = vld [vmem:[#allocation6 + $0x498] sm:$0xff]   ;;  %v1271_v9 = vadd.f32 %v6610_v19, %v1078_v45  ;;  %v5921_v1 = vld [vmem:[#allocation6 + $0x680] sm:$0xff]  }
 0x284   :  { %5434 = vmatpush3.bf16.msra.mxu0 %v5845_v13  ;;  %5321 = vmatprep.subr.bf16.mxu1 %v5846_v48  ;;  %v5881_v13 = vld [vmem:[#allocation6 + $0x708] sm:$0xff]   ;;  %v5882_v48 = vld [vmem:[#allocation6 + $0x4d0] sm:$0xff]   ;;  %v1341_v49 = vmax.f32 %v1267_v18, 0.0  ;;  %v5890_v19 = vld [vmem:[#allocation6 + $0x5f8] sm:$0xff]  }
 0x285   :  { %5435 = vmatprep.subr.bf16.mxu0 %v5847_v11  ;;  %v5883_v11 = vld [vmem:[#allocation6 + $0x740] sm:$0xff]   ;;  %v1343_v12 = vmax.f32 %v1271_v9, 0.0  ;;  %v5922_v45 = vld [vmem:[#allocation6 + $0x7f8] sm:$0xff]   ;;  %v5926_v9 = vld [vmem:[#allocation6 + $0x7e8] sm:$0xff]  }
 0x287   :  { %5322 = vmatpush3.bf16.msra.mxu1 %v5848_v43  ;;  %v5887_v43 = vld [vmem:[#allocation6 + $0x488] sm:$0xff]  }
 0x288   :  { %5436 = vmatpush3.bf16.msra.mxu0 %v5849_v7  ;;  %5323 = vmatprep.subr.bf16.mxu1 %v5850_v15  ;;  %v5888_v7 = vld [vmem:[#allocation6 + $0x4c0] sm:$0xff]   ;;  %v5155_v15 = vpack.c.bf16 %v1343_v12, %v1341_v49  ;;  %v5931_v49 = vld [vmem:[#allocation6 + $0x798] sm:$0xff]   ;;  %v5932_v12 = vld [vmem:[#allocation6 + $0x7d0] sm:$0xff]  }
 0x289   :  { %5437 = vmatprep.subr.bf16.mxu0 %v5851_v20  ;;  %v5893_v20 = vld [vmem:[#allocation6 + $0x5b0] sm:$0xff]  }
 0x28b   :  { %5324 = vmatpush3.bf16.msra.mxu1 %v5852_v0  ;;  %v5896_v0 = vld [vmem:[#allocation6 + $0x5e0] sm:$0xff]  }
 0x28c   :  { %5438 = vmatpush3.bf16.msra.mxu0 %v5853_v61  ;;  %5325 = vmatprep.subr.bf16.mxu1 %v5854_v28  ;;  %v5897_v61 = vld [vmem:[#allocation6 + $0x5a0] sm:$0xff]   ;;  %v5898_v28 = vld [vmem:[#allocation6 + $0x5d8] sm:$0xff]  }
 0x28d   :  { %5467 = vmatprep.subr.bf16.mxu0 %v5855_v29  ;;  %v5904_v29 = vld [vmem:[#allocation6 + $0x5c0] sm:$0xff]  }
 0x28f   :  { %3950 = vmatmul.mubr.bf16.vlgmr.msra.gmra.mxu0 %v5151_v39  ;;  %5326 = vmatpush3.bf16.msra.mxu1 %v5856_v32  ;;  %v5906_v32 = vld [vmem:[#allocation6 + $0x6f8] sm:$0xff]   ;;  %v5909_v39 = vld [vmem:[#allocation6 + $0x6b0] sm:$0xff]  }
 0x290   :  { %5468 = vmatpush3.bf16.msra.mxu0 %v5857_v21  ;;  %5327 = vmatprep.subr.bf16.mxu1 %v5858_v30  ;;  %v5907_v21 = vld [vmem:[#allocation6 + $0x6b8] sm:$0xff]   ;;  %v5908_v30 = vld [vmem:[#allocation6 + $0x6f0] sm:$0xff]  }
 0x291   :  { %5469 = vmatprep.subr.bf16.mxu0 %v5859_v26  ;;  %4317 = vmatprep.mubr.bf16.mxu0 %v5156_v33  ;;  %v5910_v33 = vld [vmem:[#allocation6 + $0x6e8] sm:$0xff]   ;;  %v6632_v26 = vpop.f32.mrf.mxu1 }
 0x293   :  { %5328 = vmatpush3.bf16.msra.mxu1 %v5860_v38  ;;  %v5911_v38 = vld [vmem:[#allocation6 + $0x6a8] sm:$0xff]  }
 0x294   :  { %5470 = vmatpush3.bf16.msra.mxu0 %v5861_v52  ;;  %5357 = vmatprep.subr.bf16.mxu1 %v5862_v25  ;;  %v5912_v52 = vld [vmem:[#allocation6 + $0x6e0] sm:$0xff]   ;;  %v1085_v25 = vpop.f32.mrf.mxu1 }
 0x295   :  { %5471 = vmatprep.subr.bf16.mxu0 %v5863_v36  ;;  %v6634_v36 = vpop.f32.mrf.mxu0 }
 0x296   :  { %3030 = vmatmul.mubr.bf16.vlgmr.msra.gmra.mxu1 %v6498_v8  ;;  %v5876_v8 = vld [vmem:[#allocation6 + $0x4a0] sm:$0xff]  }
 0x297   :  { %5358 = vmatpush3.bf16.msra.mxu1 %v5864_v59  ;;  %3397 = vmatprep.mubr.bf16.mxu1 %v6538_v22  ;;  %v5877_v22 = vld [vmem:[#allocation6 + $0x710] sm:$0xff]   ;;  %v5913_v59 = vld [vmem:[#allocation6 + $0x6a0] sm:$0xff]  }
 0x298   :  { %5472 = vmatpush3.bf16.msra.mxu0 %v5865_v47  ;;  %5359 = vmatprep.subr.bf16.mxu1 %v5866_v58  ;;  %v5914_v47 = vld [vmem:[#allocation6 + $0x6d8] sm:$0xff]   ;;  %v1278_v58 = vpop.f32.mrf.mxu0 }
 0x299   :  { %5473 = vmatprep.subr.bf16.mxu0 %v5867_v50  ;;  %v5916_v50 = vld [vmem:[#allocation6 + $0x6d0] sm:$0xff]  }
 0x29b   :  { %5360 = vmatpush3.bf16.msra.mxu1 %v5868_v14 }
 0x29c   :  { %5474 = vmatpush3.bf16.msra.mxu0 %v5869_v53  ;;  %5361 = vmatprep.subr.bf16.mxu1 %v5870_v55  ;;  %v1280_v53 = vpop.f32.mrf.mxu0  ;;  %v5917_v55 = vld [vmem:[#allocation6 + $0x690] sm:$0xff]  }
 0x29d   :  { %5475 = vmatprep.subr.bf16.mxu0 %v5871_v56  ;;  %v5918_v56 = vld [vmem:[#allocation6 + $0x6c8] sm:$0xff]  }
 0x29f   :  { %5362 = vmatpush3.bf16.msra.mxu1 %v5872_v4  ;;  %v1086_v4 = vadd.f32 %v1085_v25, %v6412_v37 }
 0x2a0   :  { %5476 = vmatpush3.bf16.msra.mxu0 %v5873_v60  ;;  %5363 = vmatprep.subr.bf16.mxu1 %v5874_v63  ;;  %v1282_v63 = vpop.f32.mrf.mxu0 }
 0x2a1   :  { %5477 = vmatprep.subr.bf16.mxu0 %v5875_v16  ;;  %v5919_v16 = vld [vmem:[#allocation6 + $0x688] sm:$0xff]  }
 0x2a3   :  { %5364 = vmatpush3.bf16.msra.mxu1 %v5876_v8  ;;  %v5920_v8 = vld [vmem:[#allocation6 + $0x6c0] sm:$0xff]  }
 0x2a4   :  { %5478 = vmatpush3.bf16.msra.mxu0 %v5877_v22  ;;  %5365 = vmatprep.subr.bf16.mxu1 %v5878_v57  ;;  %v1279_v22 = vadd.f32 %v1278_v58, %v1086_v4 }
 0x2a5   :  { %5479 = vmatprep.subr.bf16.mxu0 %v5879_v3 }
 0x2a6   :  { %v1346_v3 = vmax.f32 %v1279_v22, 0.0 }
 0x2a7   :  { %5366 = vmatpush3.bf16.msra.mxu1 %v5880_v2 }
 0x2a8   :  { %5480 = vmatpush3.bf16.msra.mxu0 %v5881_v13  ;;  %5367 = vmatprep.subr.bf16.mxu1 %v5882_v48  ;;  %v5923_v13 = vld [vmem:[#allocation6 + $0x7b8] sm:$0xff]   ;;  %v5924_v48 = vld [vmem:[#allocation6 + $0x7f0] sm:$0xff]  }
 0x2a9   :  { %5481 = vmatprep.subr.bf16.mxu0 %v5883_v11  ;;  %v5927_v11 = vld [vmem:[#allocation6 + $0x7a8] sm:$0xff]  }
 0x2ab   :  { %5368 = vmatpush3.bf16.msra.mxu1 %v5884_v41  ;;  %v5928_v41 = vld [vmem:[#allocation6 + $0x7e0] sm:$0xff]  }
 0x2ac   :  { %5482 = vmatpush3.bf16.msra.mxu0 %v5885_v44  ;;  %5369 = vmatprep.subr.bf16.mxu1 %v5886_v62  ;;  %v5929_v44 = vld [vmem:[#allocation6 + $0x7a0] sm:$0xff]   ;;  %v5930_v62 = vld [vmem:[#allocation6 + $0x7d8] sm:$0xff]  }
 0x2af   :  { %4318 = vmatmul.mubr.bf16.vlgmr.msra.gmra.mxu0 %v5155_v15  ;;  %5370 = vmatpush3.bf16.msra.mxu1 %v5887_v43  ;;  %v5933_v43 = vld [vmem:[#allocation6 + $0x790] sm:$0xff]   ;;  %v5934_v15 = vld [vmem:[#allocation6 + $0x7c8] sm:$0xff]  }
 0x2b0   :  { %5371 = vmatprep.subr.bf16.mxu1 %v5888_v7 }
 0x2b3   :  { %5372 = vmatpush3.bf16.msra.mxu1 %v5889_v5  ;;  %v5935_v5 = vld [vmem:[#allocation6 + $0x788] sm:$0xff]  }
 0x2b4   :  { %5401 = vmatprep.subr.bf16.mxu1 %v5890_v19 }
 0x2b6   :  { %3398 = vmatmul.mubr.bf16.vlgmr.msra.gmra.mxu1 %v6534_v23  ;;  %v5901_v23 = vld [vmem:[#allocation6 + $0x590] sm:$0xff]  }
 0x2b7   :  { %5402 = vmatpush3.bf16.msra.mxu1 %v5891_v17  ;;  %3765 = vmatprep.mubr.bf16.mxu1 %v6572_v34  ;;  %v5903_v34 = vld [vmem:[#allocation6 + $0x588] sm:$0xff]  }
 0x2b8   :  { %5403 = vmatprep.subr.bf16.mxu1 %v5892_v54  ;;  %v5936_v54 = vld [vmem:[#allocation6 + $0x7c0] sm:$0xff]  }
 0x2bb   :  { %5404 = vmatpush3.bf16.msra.mxu1 %v5893_v20  ;;  %v5937_v20 = vld [vmem:[#allocation6 + $0x780] sm:$0xff]  }
 0x2bc   :  { %5405 = vmatprep.subr.bf16.mxu1 %v5894_v10 }
 0x2bf   :  { %5406 = vmatpush3.bf16.msra.mxu1 %v5895_v6 }
 0x2c0   :  { %5407 = vmatprep.subr.bf16.mxu1 %v5896_v0 }
 0x2c3   :  { %5408 = vmatpush3.bf16.msra.mxu1 %v5897_v61  ;;  %v6017_v61 = vmov 0.0  }
 0x2c4   :  { %5409 = vmatprep.subr.bf16.mxu1 %v5898_v28  ;;  %5520 = vmatprep.subr.bf16.mxu0 %v6017_v61  ;;  %v5939_v28 = vld [vmem:[%s6683_s7 + $0x30] sm:$0xff]  }
 0x2c5   :  { %5536 = vmatprep.mubr.msk.bf16.mxu0 %vm6018_vm1, %v6017_v61 }
 0x2c7   :  { %5410 = vmatpush3.bf16.msra.mxu1 %v5899_v24  ;;  %v5940_v24 = vld [vmem:[%s6683_s7 + $0x28] sm:$0xff]  }
 0x2c8   :  { %5411 = vmatprep.subr.bf16.mxu1 %v5900_v42  ;;  %v5941_v42 = vld [vmem:[%s6683_s7 + $0x20] sm:$0xff]  }
 0x2cb   :  { %5412 = vmatpush3.bf16.msra.mxu1 %v5901_v23 }
 0x2cc   :  { %5413 = vmatprep.subr.bf16.mxu1 %v5902_v31  ;;  %v5942_v31 = vld [vmem:[%s6683_s7 + $0x18] sm:$0xff]  }
 0x2ce   :  { %v5263_v58 = vpop.f32.mrf.mxu0 }
 0x2cf   :  { %5414 = vmatpush3.bf16.msra.mxu1 %v5903_v34 }
 0x2d0   :  { %5415 = vmatprep.subr.bf16.mxu1 %v5904_v29  ;;  %v5943_v29 = vld [vmem:[%s6683_s7 + $0x10] sm:$0xff]  }
 0x2d3   :  { %5416 = vmatpush3.bf16.msra.mxu1 %v5905_v27 }
 0x2d4   :  { %5445 = vmatprep.subr.bf16.mxu1 %v5906_v32  ;;  %v5944_v32 = vld [vmem:[%s6683_s7 + $0x8] sm:$0xff]  }
 0x2d6   :  { %3766 = vmatmul.mubr.bf16.vlgmr.msra.gmra.mxu1 %v6566_v35  ;;  %v1087_v35 = vpop.f32.mrf.mxu1 }
 0x2d7   :  { %5446 = vmatpush3.bf16.msra.mxu1 %v5907_v21  ;;  %4133 = vmatprep.mubr.bf16.mxu1 %v6586_v51  ;;  %v5915_v51 = vld [vmem:[#allocation6 + $0x698] sm:$0xff]   ;;  %v1088_v7 = vadd.f32 %v1087_v35, %v6414_v40 }
 0x2d8   :  { %5447 = vmatprep.subr.bf16.mxu1 %v5908_v30  ;;  %v1089_v14 = vpop.f32.mrf.mxu1  ;;  %v5945_v30 = vld [vmem:[%s6683_s7] sm:$0xff]  }
 0x2d9   :  { %v1090_v60 = vadd.f32 %v1089_v14, %v6412_v37  ;;  %v5925_v37 = vld [vmem:[#allocation6 + $0x7b0] sm:$0xff]   ;;  %v1281_v17 = vadd.f32 %v1280_v53, %v1088_v7 }
 0x2da   :  { %v5175_v23 = vpop.f32.mrf.mxu1 }
 0x2db   :  { %5448 = vmatpush3.bf16.msra.mxu1 %v5909_v39  ;;  %v1283_v57 = vadd.f32 %v1282_v63, %v1090_v60  ;;  %v1347_v6 = vmax.f32 %v1281_v17, 0.0 }
 0x2dc   :  { %5449 = vmatprep.subr.bf16.mxu1 %v5910_v33  ;;  %v5176_v34 = vpop.f32.mrf.mxu1 }
 0x2dd   :  { %v1348_v2 = vmax.f32 %v1283_v57, 0.0 }
 0x2de   :  { %v5178_v27 = vpop.f32.mrf.mxu1 }
 0x2df   :  { %5450 = vmatpush3.bf16.msra.mxu1 %v5911_v38  ;;  %v5158_v18 = vpack.c.bf16 %v1348_v2, %v1346_v3 }
 0x2e0   :  { %5451 = vmatprep.subr.bf16.mxu1 %v5912_v52  ;;  %v5179_v21 = vpop.f32.mrf.mxu1 }
 0x2e2   :  { %v5197_v39 = vpop.f32.mrf.mxu1 }
 0x2e3   :  { %5452 = vmatpush3.bf16.msra.mxu1 %v5913_v59 }
 0x2e4   :  { %5453 = vmatprep.subr.bf16.mxu1 %v5914_v47  ;;  %v5198_v33 = vpop.f32.mrf.mxu1 }
 0x2e7   :  { %5454 = vmatpush3.bf16.msra.mxu1 %v5915_v51 }
 0x2e8   :  { %5455 = vmatprep.subr.bf16.mxu1 %v5916_v50  ;;  %v5264_v50 = vpop.f32.mrf.mxu0 }
 0x2ea   :  { %v5266_v53 = vpop.f32.mrf.mxu0 }
 0x2eb   :  { %5456 = vmatpush3.bf16.msra.mxu1 %v5917_v55 }
 0x2ec   :  { %5457 = vmatprep.subr.bf16.mxu1 %v5918_v56  ;;  %v5267_v56 = vpop.f32.mrf.mxu0 }
 0x2ef   :  { %5458 = vmatpush3.bf16.msra.mxu1 %v5919_v16  ;;  %v5307_v60 = vpop.f32.mrf.mxu0 }
 0x2f0   :  { %5459 = vmatprep.subr.bf16.mxu1 %v5920_v8 }
 0x2f1   :  { %v5308_v16 = vpop.f32.mrf.mxu0 }
 0x2f3   :  { %5460 = vmatpush3.bf16.msra.mxu1 %v5921_v1  ;;  %v5310_v22 = vpop.f32.mrf.mxu0 }
 0x2f4   :  { %5489 = vmatprep.subr.bf16.mxu1 %v5922_v45 }
 0x2f5   :  { %v5311_v1 = vpop.f32.mrf.mxu0 }
 0x2f6   :  { %4134 = vmatmul.mubr.bf16.vlgmr.msra.gmra.mxu1 %v6584_v46  ;;  %v1084_v46 = vadd.f32 %v6632_v26, %v6414_v40  ;;  %v5938_v40 = vld [vmem:[%s6683_s7 + $0x38] sm:$0xff]   ;;  %v5200_v26 = vpop.f32.mrf.mxu1 }
 0x2f7   :  { %5490 = vmatpush3.bf16.msra.mxu1 %v5923_v13  ;;  %4501 = vmatprep.mubr.bf16.mxu1 %v5158_v18 }
 0x2f8   :  { %5491 = vmatprep.subr.bf16.mxu1 %v5924_v48  ;;  %v1277_v19 = vadd.f32 %v6634_v36, %v1084_v46  ;;  %5521 = vmatpush3.bf16.msra.mxu0 %v5938_v40  ;;  %v5201_v38 = vpop.f32.mrf.mxu1 }
 0x2f9   :  { %5522 = vmatprep.subr.bf16.mxu0 %v6017_v61  ;;  %v5202_v46 = vadd.f32 %v5201_v38, %v5200_v26 }
 0x2fa   :  { %v1345_v10 = vmax.f32 %v1277_v19, 0.0  ;;  %v5219_v52 = vpop.f32.mrf.mxu1 }
 0x2fb   :  { %5492 = vmatpush3.bf16.msra.mxu1 %v5925_v37 }
 0x2fc   :  { %5493 = vmatprep.subr.bf16.mxu1 %v5926_v9  ;;  %v5157_v0 = vpack.c.bf16 %v1347_v6, %v1345_v10  ;;  %5523 = vmatpush3.bf16.msra.mxu0 %v5939_v28  ;;  %v5220_v25 = vpop.f32.mrf.mxu1 }
 0x2fd   :  { %5524 = vmatprep.subr.bf16.mxu0 %v6017_v61 }
 0x2fe   :  { %v5222_v36 = vpop.f32.mrf.mxu1 }
 0x2ff   :  { %5494 = vmatpush3.bf16.msra.mxu1 %v5927_v11 }
 0x300   :  { %5495 = vmatprep.subr.bf16.mxu1 %v5928_v41  ;;  %5525 = vmatpush3.bf16.msra.mxu0 %v5940_v24  ;;  %v5223_v59 = vpop.f32.mrf.mxu1  ;;  %v5199_v41 = vadd.f32 %v5198_v33, %v5197_v39 }
 0x301   :  { %5526 = vmatprep.subr.bf16.mxu0 %v6017_v61  ;;  %v5224_v17 = vadd.f32 %v5223_v59, %v5222_v36  ;;  %v5312_v36 = vadd.f32 %v5311_v1, %v5310_v22 }
 0x303   :  { %5496 = vmatpush3.bf16.msra.mxu1 %v5929_v44 }
 0x304   :  { %5497 = vmatprep.subr.bf16.mxu1 %v5930_v62  ;;  %5527 = vmatpush3.bf16.msra.mxu0 %v5941_v42  ;;  %v5177_v62 = vadd.f32 %v5176_v34, %v5175_v23 }
 0x305   :  { %5528 = vmatprep.subr.bf16.mxu0 %v6017_v61 }
 0x307   :  { %5498 = vmatpush3.bf16.msra.mxu1 %v5931_v49  ;;  %v5221_v49 = vadd.f32 %v5220_v25, %v5219_v52 }
 0x308   :  { %5499 = vmatprep.subr.bf16.mxu1 %v5932_v12  ;;  %5529 = vmatpush3.bf16.msra.mxu0 %v5942_v31 }
 0x309   :  { %5530 = vmatprep.subr.bf16.mxu0 %v6017_v61 }
 0x30b   :  { %5500 = vmatpush3.bf16.msra.mxu1 %v5933_v43  ;;  %v1930_v43 = vadd.f32 %v5199_v41, %v5177_v62 }
 0x30c   :  { %5501 = vmatprep.subr.bf16.mxu1 %v5934_v15  ;;  %5531 = vmatpush3.bf16.msra.mxu0 %v5943_v29  ;;  %v5268_v29 = vadd.f32 %v5267_v56, %v5266_v53 }
 0x30d   :  { %5532 = vmatprep.subr.bf16.mxu0 %v6017_v61  ;;  %v2118_v19 = vadd.f32 %v5221_v49, %v1930_v43 }
 0x30f   :  { %5502 = vmatpush3.bf16.msra.mxu1 %v5935_v5  ;;  %v5351_v3 = vpop.f32.mrf.mxu0  ;;  %v5180_v5 = vadd.f32 %v5179_v21, %v5178_v27  ;;  %v5309_v27 = vadd.f32 %v5308_v16, %v5307_v60 }
 0x310   :  { %5503 = vmatprep.subr.bf16.mxu1 %v5936_v54  ;;  %5533 = vmatpush3.bf16.msra.mxu0 %v5944_v32 }
 0x311   :  { %5534 = vmatprep.subr.bf16.mxu0 %v6017_v61  ;;  %v5352_v13 = vpop.f32.mrf.mxu0  ;;  %v5265_v61 = vadd.f32 %v5264_v50, %v5263_v58 }
 0x312   :  { %v5353_v58 = vadd.f32 %v5352_v13, %v5351_v3 }
 0x313   :  { %5504 = vmatpush3.bf16.msra.mxu1 %v5937_v20  ;;  %v5354_v18 = vpop.f32.mrf.mxu0  ;;  %v1933_v20 = vadd.f32 %v5202_v46, %v5180_v5 }
 0x314   :  { %5535 = vmatpush3.bf16.msra.mxu0 %v5945_v30 }
 0x315   :  { %v5355_v9 = vpop.f32.mrf.mxu0  ;;  %v2119_v28 = vadd.f32 %v5224_v17, %v1933_v20 }
 0x316   :  { %4502 = vmatmul.mubr.bf16.vlgmr.msra.gmra.mxu1 %v5157_v0  ;;  %v5241_v47 = vpop.f32.mrf.mxu1 }
 0x318   :  { %v5242_v35 = vpop.f32.mrf.mxu1 }
 0x319   :  { %v5243_v7 = vadd.f32 %v5242_v35, %v5241_v47 }
 0x31a   :  { %v5244_v51 = vpop.f32.mrf.mxu1 }
 0x31b   :  { %v2302_v10 = vadd.f32 %v5243_v7, %v2118_v19 }
 0x31c   :  { %v5245_v14 = vpop.f32.mrf.mxu1 }
 0x31d   :  { %v5246_v6 = vadd.f32 %v5245_v14, %v5244_v51  ;;  %v2486_v23 = vadd.f32 %v5265_v61, %v2302_v10 }
 0x31f   :  { %v2303_v42 = vadd.f32 %v5246_v6, %v2119_v28 }
 0x321   :  { %v2487_v21 = vadd.f32 %v5268_v29, %v2303_v42 }
 0x32f   :  { %v5395_v44 = vpop.f32.mrf.mxu0 }
 0x331   :  { %v5396_v15 = vpop.f32.mrf.mxu0 }
 0x333   :  { %v5398_v0 = vpop.f32.mrf.mxu0 }
 0x335   :  { %v5399_v31 = vpop.f32.mrf.mxu0 }
 0x336   :  { %v5285_v55 = vpop.f32.mrf.mxu1 }
 0x338   :  { %v5286_v4 = vpop.f32.mrf.mxu1 }
 0x339   :  { %v5287_v24 = vadd.f32 %v5286_v4, %v5285_v55  ;;  %v5356_v4 = vadd.f32 %v5355_v9, %v5354_v18 }
 0x33a   :  { %v5288_v63 = vpop.f32.mrf.mxu1 }
 0x33b   :  { %v2670_v32 = vadd.f32 %v5287_v24, %v2486_v23  ;;  %v5085_v24 = vld [vmem:[%s6682_s6] ss:$0 sm:$0xff]  ;;  %s5986_s6 = scalar_lea.vmem %s4644_s16, 256 }
 0x33c   :  { %v5289_v8 = vpop.f32.mrf.mxu1  ;;  %p5987_p10 = scmp.ne.s32.totalorder %s4644_s16, %s5986_s6  ;;  %p5992_p12 = scmp.lt.s32.totalorder %s5986_s6, %s5986_s6 }
 0x33d   :  { %v5290_v30 = vadd.f32 %v5289_v8, %v5288_v63  ;;  %v2854_v52 = vadd.f32 %v5309_v27, %v2670_v32 }
 0x33e   :  { %p5993_p13 = por %p5992_p12, %p5991_p11 }
 0x33f   :  { %v2671_v38 = vadd.f32 %v5290_v30, %v2487_v21  ;;  %v5086_v21 = vld [vmem:[%s6684_s8] ss:$0 sm:$0xff] }
 0x340   :  { %p5994_p0 = pnand %p5993_p13, %p5987_p10 }
 0x341   :  { %v2855_v51 = vadd.f32 %v5312_v36, %v2671_v38 }
 0x34f   :  { %v5439_v39 = vpop.f32.mrf.mxu0 }
 0x351   :  { %v5440_v25 = vpop.f32.mrf.mxu0 }
 0x353   :  { %v5442_v14 = vpop.f32.mrf.mxu0 }
 0x355   :  { %v5443_v16 = vpop.f32.mrf.mxu0 }
 0x356   :  { %v5329_v57 = vpop.f32.mrf.mxu1  ;;  %v5444_v7 = vadd.f32 %v5443_v16, %v5442_v14 }
 0x358   :  { %v5330_v45 = vpop.f32.mrf.mxu1 }
 0x359   :  { %v5331_v33 = vadd.f32 %v5330_v45, %v5329_v57  ;;  %v5397_v57 = vadd.f32 %v5396_v15, %v5395_v44 }
 0x35a   :  { %v5332_v2 = vpop.f32.mrf.mxu1 }
 0x35b   :  { %v3038_v59 = vadd.f32 %v5331_v33, %v2854_v52 }
 0x35c   :  { %v5333_v48 = vpop.f32.mrf.mxu1 }
 0x35d   :  { %v5334_v47 = vadd.f32 %v5333_v48, %v5332_v2  ;;  %v3222_v56 = vadd.f32 %v5353_v58, %v3038_v59  ;;  %v5400_v48 = vadd.f32 %v5399_v31, %v5398_v0 }
 0x35f   :  { %v3039_v53 = vadd.f32 %v5334_v47, %v2855_v51 }
 0x361   :  { %v3223_v45 = vadd.f32 %v5356_v4, %v3039_v53 }
 0x36f   :  { %v5483_v62 = vpop.f32.mrf.mxu0 }
 0x376   :  { %v5373_v37 = vpop.f32.mrf.mxu1 }
 0x378   :  { %v5374_v11 = vpop.f32.mrf.mxu1 }
 0x379   :  { %v5375_v50 = vadd.f32 %v5374_v11, %v5373_v37  ;;  %v5484_v37 = vpop.f32.mrf.mxu0  ;;  %v5441_v11 = vadd.f32 %v5440_v25, %v5439_v39 }
 0x37a   :  { %v5376_v12 = vpop.f32.mrf.mxu1  ;;  %v5485_v19 = vadd.f32 %v5484_v37, %v5483_v62 }
 0x37b   :  { %v3406_v63 = vadd.f32 %v5375_v50, %v3222_v56 }
 0x37c   :  { %v5377_v54 = vpop.f32.mrf.mxu1 }
 0x37d   :  { %v5378_v60 = vadd.f32 %v5377_v54, %v5376_v12  ;;  %v3590_v1 = vadd.f32 %v5397_v57, %v3406_v63  ;;  %v5486_v12 = vpop.f32.mrf.mxu0 }
 0x37f   :  { %v3407_v22 = vadd.f32 %v5378_v60, %v3223_v45  ;;  %v5487_v54 = vpop.f32.mrf.mxu0 }
 0x380   :  { %v5488_v61 = vadd.f32 %v5487_v54, %v5486_v12 }
 0x381   :  { %v3591_v49 = vadd.f32 %v5400_v48, %v3407_v22 }
 0x396   :  { %v5417_v40 = vpop.f32.mrf.mxu1 }
 0x398   :  { %v5418_v34 = vpop.f32.mrf.mxu1 }
 0x399   :  { %v5419_v41 = vadd.f32 %v5418_v34, %v5417_v40 }
 0x39a   :  { %v5420_v26 = vpop.f32.mrf.mxu1 }
 0x39b   :  { %v3774_v3 = vadd.f32 %v5419_v41, %v3590_v1 }
 0x39c   :  { %v5421_v35 = vpop.f32.mrf.mxu1 }
 0x39d   :  { %v5422_v13 = vadd.f32 %v5421_v35, %v5420_v26  ;;  %v3958_v9 = vadd.f32 %v5441_v11, %v3774_v3 }
 0x39f   :  { %v3775_v18 = vadd.f32 %v5422_v13, %v3591_v49 }
 0x3a1   :  { %v3959_v17 = vadd.f32 %v5444_v7, %v3775_v18 }
 0x3b6   :  { %v5461_v55 = vpop.f32.mrf.mxu1 }
 0x3b8   :  { %v5462_v8 = vpop.f32.mrf.mxu1 }
 0x3b9   :  { %v5463_v43 = vadd.f32 %v5462_v8, %v5461_v55 }
 0x3ba   :  { %v5464_v2 = vpop.f32.mrf.mxu1 }
 0x3bb   :  { %v4142_v5 = vadd.f32 %v5463_v43, %v3958_v9 }
 0x3bc   :  { %v5465_v46 = vpop.f32.mrf.mxu1 }
 0x3bd   :  { %v5466_v44 = vadd.f32 %v5465_v46, %v5464_v2  ;;  %v4326_v6 = vadd.f32 %v5485_v19, %v4142_v5 }
 0x3bf   :  { %v4143_v10 = vadd.f32 %v5466_v44, %v3959_v17 }
 0x3c1   :  { %v4327_v23 = vadd.f32 %v5488_v61, %v4143_v10 }
 0x3d6   :  { %v5505_v15 = vpop.f32.mrf.mxu1 }
 0x3d8   :  { %v5506_v20 = vpop.f32.mrf.mxu1 }
 0x3d9   :  { %v5507_v0 = vadd.f32 %v5506_v20, %v5505_v15 }
 0x3da   :  { %v5508_v40 = vpop.f32.mrf.mxu1 }
 0x3db   :  { %v4510_v28 = vadd.f32 %v5507_v0, %v4326_v6 }
 0x3dc   :  { %v5509_v42 = vpop.f32.mrf.mxu1 }
 0x3dd   :  { %v5510_v31 = vadd.f32 %v5509_v42, %v5508_v40  ;;  %v4519_v34 = vadd.f32 %v5085_v24, %v4510_v28 }
 0x3df   :  { %v4511_v29 = vadd.f32 %v5510_v31, %v4327_v23  ;;  %v4521_v30 = vmax.f32 %v4519_v34, 0.0 }
 0x3e1   :  { %v4520_v32 = vadd.f32 %v5085_v24, %v4511_v29 }
 0x3e3   :  { %v4522_v39 = vmax.f32 %v4520_v32, 0.0 }
 0x3e5   :  { %v4523_v27 = vpack.c.bf16 %v4522_v39, %v4521_v30 }
 0x3e7   :  { %5537 = vmatmul.mubr.bf16.vlgmr.msra.gmra.mxu0 %v4523_v27 }
 0x4a7   :  { %v4629_v33 = vpop.f32.mrf.mxu0 }
 0x4a8   :  { %v4630_v26 = vadd.f32 %v5086_v21, %v4629_v33 }
 0x4a9   :  { %v5538_v38 = vpop.f32.mrf.mxu0 }
 0x4aa   :  { %4636 = vst [vmem:[#allocation8] sm:$0xff] %v4630_v26 }
 0x4ab   :  { %v4632_v52 = vpop.f32.mrf.mxu0 }
 0x4ac   :  { %v4633_v25 = vadd.f32 %v5086_v21, %v4632_v52 }
 0x4ad   :  { %v5539_v36 = vpop.f32.mrf.mxu0 }
 0x4ae   :  { %4637 = vst [vmem:[#allocation8 + $0x8] sm:$0xff] %v4633_v25 }
 0x4af   :  { %5997 = shalt.err (!%p5994_p0)
}
 0x4b0   :  { %s6020_s17 = smov 128   ;;  %s6021_s8 = smov 8  }
 0x4b1   :  { %4649 = dma.vmem_to_hbm [thread:$0]  %s4644_s16, 256, %s6685_s9, [#allocation5], %s6020_s17, %s6020_s17, %s6021_s8  }
 0x4b2   :  { %6010 = dma.done.wait [#allocation5], 256  }
 0x4b3   :  { %6011 = vsyncadd [#allocation5], 4294967040 }
 0x4b4   :  { %4653 = vsyncpa [#allocation4], 1 }
 0x4b5   :  { %4654 = vsyncpa [#allocation7], 1 }
 0x4b6   :  { %4655 = vsyncpa [#allocation5], 1 }

</bundles_post_ra>
